<compile_context>
chip_gen: v6e
topology: v6e:2x2x1
jax: 0.10.0
libtpu: 0.0.40
codegen_flags: <defaults>
</compile_context>

<pallas_src>
import jax
import jax.numpy as jnp
from jax import lax
from jax.experimental import pallas as pl
from jax.experimental.pallas import tpu as pltpu

EPS = 1e-5  # nn.BatchNorm1d default eps


# -----------------------------------------------------------------------------
# Pallas kernel: GRU recurrence + BatchNorm1d (batch stats) + Linear head
# -----------------------------------------------------------------------------
def gru_kernel(x_ref,        # (S, D)
               wcat_ref,     # (D, 3*HP)   input->gate weights, tiles [r|z|n]
               ucat_ref,     # (HP, 3*HP)  hidden->gate weights, tiles [r|z|n]
               rows_ref,     # (5, 3*HP)   row 0: fused gate biases [br|bz|bin]
                             #             row 1: b_hn | row 2: gamma | row 3: beta
                             #             row 4: b_out (lanes 0:O)
               wout_ref,     # (HP, O)     Linear head weight (zero-padded rows)
               out_ref):     # (S, O)
    S = x_ref.shape[0]
    HP = ucat_ref.shape[0]
    O = out_ref.shape[1]

    # Input projections for ALL timesteps in one fused MXU dot, off the serial
    # critical path.  r/z tiles get (b_ih + b_hh) folded in; the n tile gets
    # only b_in because b_hn must be gated by r inside the recurrence.
    gx = (jnp.dot(x_ref[...], wcat_ref[...], preferred_element_type=jnp.float32)
          + rows_ref[0:1, :])

    # Hoist loop-invariant recurrent weights / bias out of the recurrence.
    u_cat = ucat_ref[...]             # (HP, 3*HP)
    b_hn = rows_ref[1:2, 0:HP]        # (1, HP)

    # Statically unrolled recurrence (PyTorch gate order r, z, n).  h and the
    # per-step history stay entirely in vregs (no per-step VMEM round trip).
    # Zero-padded lanes H:HP of h remain exactly 0 throughout (padded weight
    # columns/rows and padded biases are 0).
    hs = []
    h = None
    for t in range(S):
        gx_r = gx[t:t + 1, 0:HP]
        gx_z = gx[t:t + 1, HP:2 * HP]
        gx_n = gx[t:t + 1, 2 * HP:3 * HP]
        if h is None:
            # h_0 = 0  ->  gh_r = gh_z = 0, gh_n = 0 (b_hn added below);
            # skip the step-0 matmul entirely.
            r = jax.nn.sigmoid(gx_r)
            z = jax.nn.sigmoid(gx_z)
            n = jnp.tanh(gx_n + r * b_hn)
            h = (1.0 - z) * n
        else:
            # ONE fused MXU dot on the serial h chain; slicing the (1, 3*HP)
            # result at 128-lane (vreg) boundaries is free.
            gh = jnp.dot(h, u_cat, preferred_element_type=jnp.float32)
            r = jax.nn.sigmoid(gx_r + gh[:, 0:HP])
            z = jax.nn.sigmoid(gx_z + gh[:, HP:2 * HP])
            n = jnp.tanh(gx_n + r * (gh[:, 2 * HP:3 * HP] + b_hn))
            h = (1.0 - z) * n + z * h
        hs.append(h)

    hs_all = jnp.concatenate(hs, axis=0)     # (S, HP), assembled in registers

    # BatchNorm1d over the "batch" axis (= seq after squeeze): training-mode
    # batch statistics, biased variance, gamma/beta affine.
    mean = jnp.mean(hs_all, axis=0, keepdims=True)
    var = jnp.mean((hs_all - mean) ** 2, axis=0, keepdims=True)
    gamma = rows_ref[2:3, 0:HP]
    beta = rows_ref[3:4, 0:HP]
    y = gamma * ((hs_all - mean) * lax.rsqrt(var + EPS)) + beta

    # Linear head: padded lanes of y are exactly 0 (hs padded lanes are 0 and
    # beta padded lanes are 0) and padded rows of wout are 0, so the padding
    # never leaks into the output.
    out_ref[...] = (jnp.dot(y, wout_ref[...], preferred_element_type=jnp.float32)
                    + rows_ref[4:5, 0:O])


def gru_forward(x, w_ih, w_hh, b_ih, b_hh, gamma, beta, w_out, b_out):
    """x: (S, D) f32 (the PyTorch (seq, batch=1, input_dim) input with the
    batch dim squeezed).  Params in PyTorch layout:
       w_ih (3H, D), w_hh (3H, H), b_ih/b_hh (3H,)  -- gate order (r, z, n)
       gamma/beta (H,), w_out (O, H), b_out (O,).
    Returns (S, O) f32."""
    S, D = x.shape
    H = w_hh.shape[1]
    O = w_out.shape[0]
    HP = ((H + 127) // 128) * 128     # hidden width padded to 128-lane tiles

    def pad_cols(w):                  # (rows, H) -> (rows, HP)
        return jnp.pad(w, ((0, 0), (0, HP - H)))

    def row(v, width):                # (n,) -> (1, width), zero padded
        return jnp.pad(v[None, :], ((0, 0), (0, width - v.shape[0])))

    # Per-gate transposed blocks, packed so every gate sits in its own
    # 128-lane tile (lane-aligned slices in the kernel; no intra-vreg lane
    # extraction on the critical path).
    wr, wz, wn = w_ih[0:H].T, w_ih[H:2 * H].T, w_ih[2 * H:3 * H].T   # (D, H)
    ur, uz, un = w_hh[0:H].T, w_hh[H:2 * H].T, w_hh[2 * H:3 * H].T   # (H, H)
    w_cat = jnp.concatenate([pad_cols(wr), pad_cols(wz), pad_cols(wn)], axis=1)
    u_cat = jnp.pad(
        jnp.concatenate([pad_cols(ur), pad_cols(uz), pad_cols(un)], axis=1),
        ((0, HP - H), (0, 0)))                                        # (HP, 3*HP)

    # Fold biases where the math allows (r, z: b_ih + b_hh; n keeps b_hn
    # separate since it is gated by r), and pack every row vector into one
    # operand (fewer tiny kernel-entry DMAs).
    br = b_ih[0:H] + b_hh[0:H]
    bz = b_ih[H:2 * H] + b_hh[H:2 * H]
    bin_ = b_ih[2 * H:3 * H]
    bhn = b_hh[2 * H:3 * H]
    b_cat = jnp.concatenate([row(br, HP), row(bz, HP), row(bin_, HP)], axis=1)
    rows = jnp.concatenate([b_cat,
                            row(bhn, 3 * HP),
                            row(gamma, 3 * HP),
                            row(beta, 3 * HP),
                            row(b_out, 3 * HP)], axis=0)              # (5, 3*HP)

    wout_pad = jnp.pad(w_out.T, ((0, HP - H), (0, 0)))                # (HP, O)

    vmem = pl.BlockSpec(memory_space=pltpu.MemorySpace.VMEM)
    return pl.pallas_call(
        gru_kernel,
        out_shape=jax.ShapeDtypeStruct((S, O), jnp.float32),
        in_specs=[vmem] * 5,
        out_specs=vmem,
    )(x, w_cat, u_cat, rows, wout_pad)


# -----------------------------------------------------------------------------
# Pure-JAX reference for verification (original PyTorch parameter layout)
# -----------------------------------------------------------------------------
def ref_forward(x, w_ih, w_hh, b_ih, b_hh, gamma, beta, w_out, b_out):
    H = w_hh.shape[1]

    def step(h, x_t):
        gi = w_ih @ x_t + b_ih
        gh = w_hh @ h + b_hh
        r = jax.nn.sigmoid(gi[:H] + gh[:H])
        z = jax.nn.sigmoid(gi[H:2 * H] + gh[H:2 * H])
        n = jnp.tanh(gi[2 * H:] + r * gh[2 * H:])
        h_new = (1.0 - z) * n + z * h
        return h_new, h_new

    _, hs = lax.scan(step, jnp.zeros((H,), jnp.float32), x)
    mean = hs.mean(axis=0)
    var = ((hs - mean) ** 2).mean(axis=0)
    y = gamma * (hs - mean) / jnp.sqrt(var + EPS) + beta
    return y @ w_out.T + b_out


# -----------------------------------------------------------------------------
# Deterministic parameter init (shapes from nn.GRU / BatchNorm1d / Linear)
# -----------------------------------------------------------------------------
def xavier_normal(key, shape):
    fan_out, fan_in = shape
    std = (2.0 / (fan_in + fan_out)) ** 0.5
    return std * jax.random.normal(key, shape, jnp.float32)


if __name__ == "__main__":
    # cfg: input_dim=16, hidden_dim=32, output_dim=8, layers=1,
    #      dropout=0.0, bidirectional=False, batch_size=1
    SEQ, BATCH, IN_D, HID, OUT_D = 8, 1, 16, 32, 8

    key = jax.random.PRNGKey(0)
    ks = jax.random.split(key, 8)

    # nn.GRU parameters (layer 0): weight_ih (3H, D), weight_hh (3H, H), biases (3H,)
    w_ih = xavier_normal(ks[0], (3 * HID, IN_D))
    w_hh = xavier_normal(ks[1], (3 * HID, HID))
    b_ih = 0.05 * jax.random.normal(ks[2], (3 * HID,), jnp.float32)
    b_hh = 0.05 * jax.random.normal(ks[3], (3 * HID,), jnp.float32)

    # BatchNorm1d(hidden_dim): gamma=1, beta=0 (default init)
    gamma = jnp.ones((HID,), jnp.float32)
    beta = jnp.zeros((HID,), jnp.float32)

    # Linear(hidden_dim, output_dim): weight (O, H) xavier, bias (O,)
    w_out = xavier_normal(ks[4], (OUT_D, HID))
    b_out = 0.05 * jax.random.normal(ks[5], (OUT_D,), jnp.float32)

    # Input sequence in PyTorch layout (seq, batch=1, input_dim)
    seq_in = jax.random.normal(ks[6], (SEQ, BATCH, IN_D), jnp.float32)
    x = seq_in[:, 0, :]                                  # squeeze batch dim

    out = gru_forward(x, w_ih, w_hh, b_ih, b_hh, gamma, beta, w_out, b_out)
    out = jax.block_until_ready(out)

    ref = ref_forward(x, w_ih, w_hh, b_ih, b_hh, gamma, beta, w_out, b_out)
    assert out.shape == (SEQ, OUT_D)
    assert jnp.allclose(out, ref, atol=1e-4, rtol=1e-4), (
        f"max abs err {jnp.max(jnp.abs(out - ref))}")

    print("KERNEL_OK")
</pallas_src>

<mosaic_0001>
module attributes {stable_mosaic.version = 11 : i64} {
  func.func @gru_kernel(%arg0: memref<8x16xf32, #tpu.memory_space<vmem>>, %arg1: memref<16x384xf32, #tpu.memory_space<vmem>>, %arg2: memref<128x384xf32, #tpu.memory_space<vmem>>, %arg3: memref<5x384xf32, #tpu.memory_space<vmem>>, %arg4: memref<128x8xf32, #tpu.memory_space<vmem>>, %arg5: memref<8x8xf32, #tpu.memory_space<vmem>>) attributes {dimension_semantics = [], scalar_prefetch = 0 : i64, scratch_operands = 0 : i64, tpu.core_type = #tpu.core_type<tc>} {
    %c0 = arith.constant 0 : index
    %c0_0 = arith.constant 0 : index
    %0 = vector.load %arg0[%c0, %c0_0] : memref<8x16xf32, #tpu.memory_space<vmem>>, vector<8x16xf32>
    %c0_1 = arith.constant 0 : index
    %c0_2 = arith.constant 0 : index
    %1 = vector.load %arg1[%c0_1, %c0_2] : memref<16x384xf32, #tpu.memory_space<vmem>>, vector<16x384xf32>
    %cst = arith.constant dense<0.000000e+00> : vector<8x384xf32>
    %2 = tpu.matmul %0, %1, %cst {dimension_numbers = #tpu.dot_dimension_numbers<[1], [0], [0], [1], [0, 0, 1, 1], [], []>} : vector<8x16xf32>, vector<16x384xf32>, vector<8x384xf32> -> vector<8x384xf32>
    %c0_3 = arith.constant 0 : index
    %c0_4 = arith.constant 0 : index
    %3 = vector.load %arg3[%c0_3, %c0_4] : memref<5x384xf32, #tpu.memory_space<vmem>>, vector<1x384xf32>
    %4 = vector.broadcast %3 : vector<1x384xf32> to vector<8x384xf32>
    %5 = arith.addf %2, %4 : vector<8x384xf32>
    %c0_5 = arith.constant 0 : index
    %c0_6 = arith.constant 0 : index
    %6 = vector.load %arg2[%c0_5, %c0_6] : memref<128x384xf32, #tpu.memory_space<vmem>>, vector<128x384xf32>
    %c1 = arith.constant 1 : index
    %c0_7 = arith.constant 0 : index
    %7 = vector.load %arg3[%c1, %c0_7] : memref<5x384xf32, #tpu.memory_space<vmem>>, vector<1x128xf32>
    %8 = vector.extract_strided_slice %5 {offsets = [0, 0], sizes = [1, 128], strides = [1, 1]} : vector<8x384xf32> to vector<1x128xf32>
    %9 = vector.extract_strided_slice %5 {offsets = [0, 128], sizes = [1, 128], strides = [1, 1]} : vector<8x384xf32> to vector<1x128xf32>
    %10 = vector.extract_strided_slice %5 {offsets = [0, 256], sizes = [1, 128], strides = [1, 1]} : vector<8x384xf32> to vector<1x128xf32>
    %11 = arith.negf %8 : vector<1x128xf32>
    %12 = math.exp %11 : vector<1x128xf32>
    %cst_8 = arith.constant 1.000000e+00 : f32
    %13 = vector.broadcast %cst_8 : f32 to vector<1x128xf32>
    %14 = arith.addf %13, %12 : vector<1x128xf32>
    %15 = arith.divf %13, %14 : vector<1x128xf32>
    %16 = arith.negf %9 : vector<1x128xf32>
    %17 = math.exp %16 : vector<1x128xf32>
    %cst_9 = arith.constant 1.000000e+00 : f32
    %18 = vector.broadcast %cst_9 : f32 to vector<1x128xf32>
    %19 = arith.addf %18, %17 : vector<1x128xf32>
    %20 = arith.divf %18, %19 : vector<1x128xf32>
    %21 = arith.mulf %15, %7 : vector<1x128xf32>
    %22 = arith.addf %10, %21 : vector<1x128xf32>
    %23 = math.tanh %22 : vector<1x128xf32>
    %cst_10 = arith.constant 1.000000e+00 : f32
    %24 = vector.broadcast %cst_10 : f32 to vector<1x128xf32>
    %25 = arith.subf %24, %20 : vector<1x128xf32>
    %26 = arith.mulf %25, %23 : vector<1x128xf32>
    %27 = vector.extract_strided_slice %5 {offsets = [1, 0], sizes = [1, 128], strides = [1, 1]} : vector<8x384xf32> to vector<1x128xf32>
    %28 = vector.extract_strided_slice %5 {offsets = [1, 128], sizes = [1, 128], strides = [1, 1]} : vector<8x384xf32> to vector<1x128xf32>
    %29 = vector.extract_strided_slice %5 {offsets = [1, 256], sizes = [1, 128], strides = [1, 1]} : vector<8x384xf32> to vector<1x128xf32>
    %cst_11 = arith.constant dense<0.000000e+00> : vector<1x384xf32>
    %30 = tpu.matmul %26, %6, %cst_11 {dimension_numbers = #tpu.dot_dimension_numbers<[1], [0], [0], [1], [0, 0, 1, 1], [], []>} : vector<1x128xf32>, vector<128x384xf32>, vector<1x384xf32> -> vector<1x384xf32>
    %31 = vector.extract_strided_slice %30 {offsets = [0, 0], sizes = [1, 128], strides = [1, 1]} : vector<1x384xf32> to vector<1x128xf32>
    %32 = arith.addf %27, %31 : vector<1x128xf32>
    %33 = arith.negf %32 : vector<1x128xf32>
    %34 = math.exp %33 : vector<1x128xf32>
    %cst_12 = arith.constant 1.000000e+00 : f32
    %35 = vector.broadcast %cst_12 : f32 to vector<1x128xf32>
    %36 = arith.addf %35, %34 : vector<1x128xf32>
    %37 = arith.divf %35, %36 : vector<1x128xf32>
    %38 = vector.extract_strided_slice %30 {offsets = [0, 128], sizes = [1, 128], strides = [1, 1]} : vector<1x384xf32> to vector<1x128xf32>
    %39 = arith.addf %28, %38 : vector<1x128xf32>
    %40 = arith.negf %39 : vector<1x128xf32>
    %41 = math.exp %40 : vector<1x128xf32>
    %cst_13 = arith.constant 1.000000e+00 : f32
    %42 = vector.broadcast %cst_13 : f32 to vector<1x128xf32>
    %43 = arith.addf %42, %41 : vector<1x128xf32>
    %44 = arith.divf %42, %43 : vector<1x128xf32>
    %45 = vector.extract_strided_slice %30 {offsets = [0, 256], sizes = [1, 128], strides = [1, 1]} : vector<1x384xf32> to vector<1x128xf32>
    %46 = arith.addf %45, %7 : vector<1x128xf32>
    %47 = arith.mulf %37, %46 : vector<1x128xf32>
    %48 = arith.addf %29, %47 : vector<1x128xf32>
    %49 = math.tanh %48 : vector<1x128xf32>
    %cst_14 = arith.constant 1.000000e+00 : f32
    %50 = vector.broadcast %cst_14 : f32 to vector<1x128xf32>
    %51 = arith.subf %50, %44 : vector<1x128xf32>
    %52 = arith.mulf %51, %49 : vector<1x128xf32>
    %53 = arith.mulf %44, %26 : vector<1x128xf32>
    %54 = arith.addf %52, %53 : vector<1x128xf32>
    %55 = vector.extract_strided_slice %5 {offsets = [2, 0], sizes = [1, 128], strides = [1, 1]} : vector<8x384xf32> to vector<1x128xf32>
    %56 = vector.extract_strided_slice %5 {offsets = [2, 128], sizes = [1, 128], strides = [1, 1]} : vector<8x384xf32> to vector<1x128xf32>
    %57 = vector.extract_strided_slice %5 {offsets = [2, 256], sizes = [1, 128], strides = [1, 1]} : vector<8x384xf32> to vector<1x128xf32>
    %cst_15 = arith.constant dense<0.000000e+00> : vector<1x384xf32>
    %58 = tpu.matmul %54, %6, %cst_15 {dimension_numbers = #tpu.dot_dimension_numbers<[1], [0], [0], [1], [0, 0, 1, 1], [], []>} : vector<1x128xf32>, vector<128x384xf32>, vector<1x384xf32> -> vector<1x384xf32>
    %59 = vector.extract_strided_slice %58 {offsets = [0, 0], sizes = [1, 128], strides = [1, 1]} : vector<1x384xf32> to vector<1x128xf32>
    %60 = arith.addf %55, %59 : vector<1x128xf32>
    %61 = arith.negf %60 : vector<1x128xf32>
    %62 = math.exp %61 : vector<1x128xf32>
    %cst_16 = arith.constant 1.000000e+00 : f32
    %63 = vector.broadcast %cst_16 : f32 to vector<1x128xf32>
    %64 = arith.addf %63, %62 : vector<1x128xf32>
    %65 = arith.divf %63, %64 : vector<1x128xf32>
    %66 = vector.extract_strided_slice %58 {offsets = [0, 128], sizes = [1, 128], strides = [1, 1]} : vector<1x384xf32> to vector<1x128xf32>
    %67 = arith.addf %56, %66 : vector<1x128xf32>
    %68 = arith.negf %67 : vector<1x128xf32>
    %69 = math.exp %68 : vector<1x128xf32>
    %cst_17 = arith.constant 1.000000e+00 : f32
    %70 = vector.broadcast %cst_17 : f32 to vector<1x128xf32>
    %71 = arith.addf %70, %69 : vector<1x128xf32>
    %72 = arith.divf %70, %71 : vector<1x128xf32>
    %73 = vector.extract_strided_slice %58 {offsets = [0, 256], sizes = [1, 128], strides = [1, 1]} : vector<1x384xf32> to vector<1x128xf32>
    %74 = arith.addf %73, %7 : vector<1x128xf32>
    %75 = arith.mulf %65, %74 : vector<1x128xf32>
    %76 = arith.addf %57, %75 : vector<1x128xf32>
    %77 = math.tanh %76 : vector<1x128xf32>
    %cst_18 = arith.constant 1.000000e+00 : f32
    %78 = vector.broadcast %cst_18 : f32 to vector<1x128xf32>
    %79 = arith.subf %78, %72 : vector<1x128xf32>
    %80 = arith.mulf %79, %77 : vector<1x128xf32>
    %81 = arith.mulf %72, %54 : vector<1x128xf32>
    %82 = arith.addf %80, %81 : vector<1x128xf32>
    %83 = vector.extract_strided_slice %5 {offsets = [3, 0], sizes = [1, 128], strides = [1, 1]} : vector<8x384xf32> to vector<1x128xf32>
    %84 = vector.extract_strided_slice %5 {offsets = [3, 128], sizes = [1, 128], strides = [1, 1]} : vector<8x384xf32> to vector<1x128xf32>
    %85 = vector.extract_strided_slice %5 {offsets = [3, 256], sizes = [1, 128], strides = [1, 1]} : vector<8x384xf32> to vector<1x128xf32>
    %cst_19 = arith.constant dense<0.000000e+00> : vector<1x384xf32>
    %86 = tpu.matmul %82, %6, %cst_19 {dimension_numbers = #tpu.dot_dimension_numbers<[1], [0], [0], [1], [0, 0, 1, 1], [], []>} : vector<1x128xf32>, vector<128x384xf32>, vector<1x384xf32> -> vector<1x384xf32>
    %87 = vector.extract_strided_slice %86 {offsets = [0, 0], sizes = [1, 128], strides = [1, 1]} : vector<1x384xf32> to vector<1x128xf32>
    %88 = arith.addf %83, %87 : vector<1x128xf32>
    %89 = arith.negf %88 : vector<1x128xf32>
    %90 = math.exp %89 : vector<1x128xf32>
    %cst_20 = arith.constant 1.000000e+00 : f32
    %91 = vector.broadcast %cst_20 : f32 to vector<1x128xf32>
    %92 = arith.addf %91, %90 : vector<1x128xf32>
    %93 = arith.divf %91, %92 : vector<1x128xf32>
    %94 = vector.extract_strided_slice %86 {offsets = [0, 128], sizes = [1, 128], strides = [1, 1]} : vector<1x384xf32> to vector<1x128xf32>
    %95 = arith.addf %84, %94 : vector<1x128xf32>
    %96 = arith.negf %95 : vector<1x128xf32>
    %97 = math.exp %96 : vector<1x128xf32>
    %cst_21 = arith.constant 1.000000e+00 : f32
    %98 = vector.broadcast %cst_21 : f32 to vector<1x128xf32>
    %99 = arith.addf %98, %97 : vector<1x128xf32>
    %100 = arith.divf %98, %99 : vector<1x128xf32>
    %101 = vector.extract_strided_slice %86 {offsets = [0, 256], sizes = [1, 128], strides = [1, 1]} : vector<1x384xf32> to vector<1x128xf32>
    %102 = arith.addf %101, %7 : vector<1x128xf32>
    %103 = arith.mulf %93, %102 : vector<1x128xf32>
    %104 = arith.addf %85, %103 : vector<1x128xf32>
    %105 = math.tanh %104 : vector<1x128xf32>
    %cst_22 = arith.constant 1.000000e+00 : f32
    %106 = vector.broadcast %cst_22 : f32 to vector<1x128xf32>
    %107 = arith.subf %106, %100 : vector<1x128xf32>
    %108 = arith.mulf %107, %105 : vector<1x128xf32>
    %109 = arith.mulf %100, %82 : vector<1x128xf32>
    %110 = arith.addf %108, %109 : vector<1x128xf32>
    %111 = vector.extract_strided_slice %5 {offsets = [4, 0], sizes = [1, 128], strides = [1, 1]} : vector<8x384xf32> to vector<1x128xf32>
    %112 = vector.extract_strided_slice %5 {offsets = [4, 128], sizes = [1, 128], strides = [1, 1]} : vector<8x384xf32> to vector<1x128xf32>
    %113 = vector.extract_strided_slice %5 {offsets = [4, 256], sizes = [1, 128], strides = [1, 1]} : vector<8x384xf32> to vector<1x128xf32>
    %cst_23 = arith.constant dense<0.000000e+00> : vector<1x384xf32>
    %114 = tpu.matmul %110, %6, %cst_23 {dimension_numbers = #tpu.dot_dimension_numbers<[1], [0], [0], [1], [0, 0, 1, 1], [], []>} : vector<1x128xf32>, vector<128x384xf32>, vector<1x384xf32> -> vector<1x384xf32>
    %115 = vector.extract_strided_slice %114 {offsets = [0, 0], sizes = [1, 128], strides = [1, 1]} : vector<1x384xf32> to vector<1x128xf32>
    %116 = arith.addf %111, %115 : vector<1x128xf32>
    %117 = arith.negf %116 : vector<1x128xf32>
    %118 = math.exp %117 : vector<1x128xf32>
    %cst_24 = arith.constant 1.000000e+00 : f32
    %119 = vector.broadcast %cst_24 : f32 to vector<1x128xf32>
    %120 = arith.addf %119, %118 : vector<1x128xf32>
    %121 = arith.divf %119, %120 : vector<1x128xf32>
    %122 = vector.extract_strided_slice %114 {offsets = [0, 128], sizes = [1, 128], strides = [1, 1]} : vector<1x384xf32> to vector<1x128xf32>
    %123 = arith.addf %112, %122 : vector<1x128xf32>
    %124 = arith.negf %123 : vector<1x128xf32>
    %125 = math.exp %124 : vector<1x128xf32>
    %cst_25 = arith.constant 1.000000e+00 : f32
    %126 = vector.broadcast %cst_25 : f32 to vector<1x128xf32>
    %127 = arith.addf %126, %125 : vector<1x128xf32>
    %128 = arith.divf %126, %127 : vector<1x128xf32>
    %129 = vector.extract_strided_slice %114 {offsets = [0, 256], sizes = [1, 128], strides = [1, 1]} : vector<1x384xf32> to vector<1x128xf32>
    %130 = arith.addf %129, %7 : vector<1x128xf32>
    %131 = arith.mulf %121, %130 : vector<1x128xf32>
    %132 = arith.addf %113, %131 : vector<1x128xf32>
    %133 = math.tanh %132 : vector<1x128xf32>
    %cst_26 = arith.constant 1.000000e+00 : f32
    %134 = vector.broadcast %cst_26 : f32 to vector<1x128xf32>
    %135 = arith.subf %134, %128 : vector<1x128xf32>
    %136 = arith.mulf %135, %133 : vector<1x128xf32>
    %137 = arith.mulf %128, %110 : vector<1x128xf32>
    %138 = arith.addf %136, %137 : vector<1x128xf32>
    %139 = vector.extract_strided_slice %5 {offsets = [5, 0], sizes = [1, 128], strides = [1, 1]} : vector<8x384xf32> to vector<1x128xf32>
    %140 = vector.extract_strided_slice %5 {offsets = [5, 128], sizes = [1, 128], strides = [1, 1]} : vector<8x384xf32> to vector<1x128xf32>
    %141 = vector.extract_strided_slice %5 {offsets = [5, 256], sizes = [1, 128], strides = [1, 1]} : vector<8x384xf32> to vector<1x128xf32>
    %cst_27 = arith.constant dense<0.000000e+00> : vector<1x384xf32>
    %142 = tpu.matmul %138, %6, %cst_27 {dimension_numbers = #tpu.dot_dimension_numbers<[1], [0], [0], [1], [0, 0, 1, 1], [], []>} : vector<1x128xf32>, vector<128x384xf32>, vector<1x384xf32> -> vector<1x384xf32>
    %143 = vector.extract_strided_slice %142 {offsets = [0, 0], sizes = [1, 128], strides = [1, 1]} : vector<1x384xf32> to vector<1x128xf32>
    %144 = arith.addf %139, %143 : vector<1x128xf32>
    %145 = arith.negf %144 : vector<1x128xf32>
    %146 = math.exp %145 : vector<1x128xf32>
    %cst_28 = arith.constant 1.000000e+00 : f32
    %147 = vector.broadcast %cst_28 : f32 to vector<1x128xf32>
    %148 = arith.addf %147, %146 : vector<1x128xf32>
    %149 = arith.divf %147, %148 : vector<1x128xf32>
    %150 = vector.extract_strided_slice %142 {offsets = [0, 128], sizes = [1, 128], strides = [1, 1]} : vector<1x384xf32> to vector<1x128xf32>
    %151 = arith.addf %140, %150 : vector<1x128xf32>
    %152 = arith.negf %151 : vector<1x128xf32>
    %153 = math.exp %152 : vector<1x128xf32>
    %cst_29 = arith.constant 1.000000e+00 : f32
    %154 = vector.broadcast %cst_29 : f32 to vector<1x128xf32>
    %155 = arith.addf %154, %153 : vector<1x128xf32>
    %156 = arith.divf %154, %155 : vector<1x128xf32>
    %157 = vector.extract_strided_slice %142 {offsets = [0, 256], sizes = [1, 128], strides = [1, 1]} : vector<1x384xf32> to vector<1x128xf32>
    %158 = arith.addf %157, %7 : vector<1x128xf32>
    %159 = arith.mulf %149, %158 : vector<1x128xf32>
    %160 = arith.addf %141, %159 : vector<1x128xf32>
    %161 = math.tanh %160 : vector<1x128xf32>
    %cst_30 = arith.constant 1.000000e+00 : f32
    %162 = vector.broadcast %cst_30 : f32 to vector<1x128xf32>
    %163 = arith.subf %162, %156 : vector<1x128xf32>
    %164 = arith.mulf %163, %161 : vector<1x128xf32>
    %165 = arith.mulf %156, %138 : vector<1x128xf32>
    %166 = arith.addf %164, %165 : vector<1x128xf32>
    %167 = vector.extract_strided_slice %5 {offsets = [6, 0], sizes = [1, 128], strides = [1, 1]} : vector<8x384xf32> to vector<1x128xf32>
    %168 = vector.extract_strided_slice %5 {offsets = [6, 128], sizes = [1, 128], strides = [1, 1]} : vector<8x384xf32> to vector<1x128xf32>
    %169 = vector.extract_strided_slice %5 {offsets = [6, 256], sizes = [1, 128], strides = [1, 1]} : vector<8x384xf32> to vector<1x128xf32>
    %cst_31 = arith.constant dense<0.000000e+00> : vector<1x384xf32>
    %170 = tpu.matmul %166, %6, %cst_31 {dimension_numbers = #tpu.dot_dimension_numbers<[1], [0], [0], [1], [0, 0, 1, 1], [], []>} : vector<1x128xf32>, vector<128x384xf32>, vector<1x384xf32> -> vector<1x384xf32>
    %171 = vector.extract_strided_slice %170 {offsets = [0, 0], sizes = [1, 128], strides = [1, 1]} : vector<1x384xf32> to vector<1x128xf32>
    %172 = arith.addf %167, %171 : vector<1x128xf32>
    %173 = arith.negf %172 : vector<1x128xf32>
    %174 = math.exp %173 : vector<1x128xf32>
    %cst_32 = arith.constant 1.000000e+00 : f32
    %175 = vector.broadcast %cst_32 : f32 to vector<1x128xf32>
    %176 = arith.addf %175, %174 : vector<1x128xf32>
    %177 = arith.divf %175, %176 : vector<1x128xf32>
    %178 = vector.extract_strided_slice %170 {offsets = [0, 128], sizes = [1, 128], strides = [1, 1]} : vector<1x384xf32> to vector<1x128xf32>
    %179 = arith.addf %168, %178 : vector<1x128xf32>
    %180 = arith.negf %179 : vector<1x128xf32>
    %181 = math.exp %180 : vector<1x128xf32>
    %cst_33 = arith.constant 1.000000e+00 : f32
    %182 = vector.broadcast %cst_33 : f32 to vector<1x128xf32>
    %183 = arith.addf %182, %181 : vector<1x128xf32>
    %184 = arith.divf %182, %183 : vector<1x128xf32>
    %185 = vector.extract_strided_slice %170 {offsets = [0, 256], sizes = [1, 128], strides = [1, 1]} : vector<1x384xf32> to vector<1x128xf32>
    %186 = arith.addf %185, %7 : vector<1x128xf32>
    %187 = arith.mulf %177, %186 : vector<1x128xf32>
    %188 = arith.addf %169, %187 : vector<1x128xf32>
    %189 = math.tanh %188 : vector<1x128xf32>
    %cst_34 = arith.constant 1.000000e+00 : f32
    %190 = vector.broadcast %cst_34 : f32 to vector<1x128xf32>
    %191 = arith.subf %190, %184 : vector<1x128xf32>
    %192 = arith.mulf %191, %189 : vector<1x128xf32>
    %193 = arith.mulf %184, %166 : vector<1x128xf32>
    %194 = arith.addf %192, %193 : vector<1x128xf32>
    %195 = vector.extract_strided_slice %5 {offsets = [7, 0], sizes = [1, 128], strides = [1, 1]} : vector<8x384xf32> to vector<1x128xf32>
    %196 = vector.extract_strided_slice %5 {offsets = [7, 128], sizes = [1, 128], strides = [1, 1]} : vector<8x384xf32> to vector<1x128xf32>
    %197 = vector.extract_strided_slice %5 {offsets = [7, 256], sizes = [1, 128], strides = [1, 1]} : vector<8x384xf32> to vector<1x128xf32>
    %cst_35 = arith.constant dense<0.000000e+00> : vector<1x384xf32>
    %198 = tpu.matmul %194, %6, %cst_35 {dimension_numbers = #tpu.dot_dimension_numbers<[1], [0], [0], [1], [0, 0, 1, 1], [], []>} : vector<1x128xf32>, vector<128x384xf32>, vector<1x384xf32> -> vector<1x384xf32>
    %199 = vector.extract_strided_slice %198 {offsets = [0, 0], sizes = [1, 128], strides = [1, 1]} : vector<1x384xf32> to vector<1x128xf32>
    %200 = arith.addf %195, %199 : vector<1x128xf32>
    %201 = arith.negf %200 : vector<1x128xf32>
    %202 = math.exp %201 : vector<1x128xf32>
    %cst_36 = arith.constant 1.000000e+00 : f32
    %203 = vector.broadcast %cst_36 : f32 to vector<1x128xf32>
    %204 = arith.addf %203, %202 : vector<1x128xf32>
    %205 = arith.divf %203, %204 : vector<1x128xf32>
    %206 = vector.extract_strided_slice %198 {offsets = [0, 128], sizes = [1, 128], strides = [1, 1]} : vector<1x384xf32> to vector<1x128xf32>
    %207 = arith.addf %196, %206 : vector<1x128xf32>
    %208 = arith.negf %207 : vector<1x128xf32>
    %209 = math.exp %208 : vector<1x128xf32>
    %cst_37 = arith.constant 1.000000e+00 : f32
    %210 = vector.broadcast %cst_37 : f32 to vector<1x128xf32>
    %211 = arith.addf %210, %209 : vector<1x128xf32>
    %212 = arith.divf %210, %211 : vector<1x128xf32>
    %213 = vector.extract_strided_slice %198 {offsets = [0, 256], sizes = [1, 128], strides = [1, 1]} : vector<1x384xf32> to vector<1x128xf32>
    %214 = arith.addf %213, %7 : vector<1x128xf32>
    %215 = arith.mulf %205, %214 : vector<1x128xf32>
    %216 = arith.addf %197, %215 : vector<1x128xf32>
    %217 = math.tanh %216 : vector<1x128xf32>
    %cst_38 = arith.constant 1.000000e+00 : f32
    %218 = vector.broadcast %cst_38 : f32 to vector<1x128xf32>
    %219 = arith.subf %218, %212 : vector<1x128xf32>
    %220 = arith.mulf %219, %217 : vector<1x128xf32>
    %221 = arith.mulf %212, %194 : vector<1x128xf32>
    %222 = arith.addf %220, %221 : vector<1x128xf32>
    %223 = tpu.concatenate %26, %54, %82, %110, %138, %166, %194, %222 in 0 : vector<1x128xf32>, vector<1x128xf32>, vector<1x128xf32>, vector<1x128xf32>, vector<1x128xf32>, vector<1x128xf32>, vector<1x128xf32>, vector<1x128xf32> -> vector<8x128xf32>
    %cst_39 = arith.constant dense<0.000000e+00> : vector<128xf32>
    %224 = vector.multi_reduction <add>, %223, %cst_39 [0] : vector<8x128xf32> to vector<128xf32>
    %225 = vector.shape_cast %224 : vector<128xf32> to vector<1x128xf32>
    %cst_40 = arith.constant 8.000000e+00 : f32
    %226 = vector.broadcast %cst_40 : f32 to vector<1x128xf32>
    %227 = arith.divf %225, %226 : vector<1x128xf32>
    %228 = vector.broadcast %227 : vector<1x128xf32> to vector<8x128xf32>
    %229 = arith.subf %223, %228 : vector<8x128xf32>
    %230 = arith.mulf %229, %229 : vector<8x128xf32>
    %cst_41 = arith.constant dense<0.000000e+00> : vector<128xf32>
    %231 = vector.multi_reduction <add>, %230, %cst_41 [0] : vector<8x128xf32> to vector<128xf32>
    %232 = vector.shape_cast %231 : vector<128xf32> to vector<1x128xf32>
    %cst_42 = arith.constant 8.000000e+00 : f32
    %233 = vector.broadcast %cst_42 : f32 to vector<1x128xf32>
    %234 = arith.divf %232, %233 : vector<1x128xf32>
    %c2 = arith.constant 2 : index
    %c0_43 = arith.constant 0 : index
    %235 = vector.load %arg3[%c2, %c0_43] : memref<5x384xf32, #tpu.memory_space<vmem>>, vector<1x128xf32>
    %c3 = arith.constant 3 : index
    %c0_44 = arith.constant 0 : index
    %236 = vector.load %arg3[%c3, %c0_44] : memref<5x384xf32, #tpu.memory_space<vmem>>, vector<1x128xf32>
    %237 = vector.broadcast %227 : vector<1x128xf32> to vector<8x128xf32>
    %238 = arith.subf %223, %237 : vector<8x128xf32>
    %cst_45 = arith.constant 9.99999974E-6 : f32
    %239 = vector.broadcast %cst_45 : f32 to vector<1x128xf32>
    %240 = arith.addf %234, %239 : vector<1x128xf32>
    %241 = math.rsqrt %240 : vector<1x128xf32>
    %242 = vector.broadcast %241 : vector<1x128xf32> to vector<8x128xf32>
    %243 = arith.mulf %238, %242 : vector<8x128xf32>
    %244 = vector.broadcast %235 : vector<1x128xf32> to vector<8x128xf32>
    %245 = arith.mulf %244, %243 : vector<8x128xf32>
    %246 = vector.broadcast %236 : vector<1x128xf32> to vector<8x128xf32>
    %247 = arith.addf %245, %246 : vector<8x128xf32>
    %c0_46 = arith.constant 0 : index
    %c0_47 = arith.constant 0 : index
    %248 = vector.load %arg4[%c0_46, %c0_47] : memref<128x8xf32, #tpu.memory_space<vmem>>, vector<128x8xf32>
    %cst_48 = arith.constant dense<0.000000e+00> : vector<8x8xf32>
    %249 = tpu.matmul %247, %248, %cst_48 {dimension_numbers = #tpu.dot_dimension_numbers<[1], [0], [0], [1], [0, 0, 1, 1], [], []>} : vector<8x128xf32>, vector<128x8xf32>, vector<8x8xf32> -> vector<8x8xf32>
    %c4 = arith.constant 4 : index
    %c0_49 = arith.constant 0 : index
    %250 = vector.load %arg3[%c4, %c0_49] : memref<5x384xf32, #tpu.memory_space<vmem>>, vector<1x8xf32>
    %251 = vector.broadcast %250 : vector<1x8xf32> to vector<8x8xf32>
    %252 = arith.addf %249, %251 : vector<8x8xf32>
    %c0_50 = arith.constant 0 : index
    %c0_51 = arith.constant 0 : index
    %253 = vector.load %arg5[%c0_50, %c0_51] : memref<8x8xf32, #tpu.memory_space<vmem>>, vector<8x8xf32>
    tpu.vector_store %arg5[%c0_50, %c0_51], %252 {strides = array<i32>} : memref<8x8xf32, #tpu.memory_space<vmem>>, vector<8x8xf32>,
    return
  }
}

</mosaic_0001>

<bundles_post_ra>
// kernel: tpu_custom_call.1
= control target key start
LH: loop header
LB: loop body
LE: loop exit
PB: predicated region body
PF: predicated region fallthrough
CT: control target
= control target key end

     0   :  { %10 = vsyncpa [#allocation3], 0  ;;  %s3180_s0 = inlined_call_operand.vmem [shape: f32[8,16], index: 0, kind: input, shape index: {}]   ;;  %s3181_s1 = inlined_call_operand.vmem [shape: f32[16,384], index: 1, kind: input, shape index: {}]   ;;  %s3182_s2 = inlined_call_operand.hbm [shape: f32[128,384], index: 2, kind: input, shape index: {}]   ;;  %s3183_s3 = inlined_call_operand.vmem [shape: f32[5,384], index: 3, kind: input, shape index: {}]   ;;  %s3184_s4 = inlined_call_operand.vmem [shape: f32[128,8], index: 4, kind: input, shape index: {}]   ;;  %s3185_s5 = inlined_call_operand.hbm [shape: f32[8,8], index: 5, kind: output, shape index: {}]  }
   0x1   :  { %11 = vsyncpa [#allocation4], 0  ;;  %s2274_s18 = smov [#allocation2]  }
   0x2   :  { %s21_s19 = sshll.u32 %s2274_s18, 4  ;;  %s22_s19 = int_to_ptr.vmem [resolvable:$true] %s21_s19 }
   0x3   :  { %s2238_s20 = scalar_lea.vmem %s22_s19, 6144  ;;  %p2243_p1 = scmp.lt.s32.totalorder %s22_s19, %s22_s19 }
   0x4   :  { %p2239_p0 = scmp.ne.s32.totalorder %s22_s19, %s2238_s20  ;;  %p2244_p2 = scmp.lt.s32.totalorder %s2238_s20, %s2238_s20 }
   0x6   :  { %p2245_p3 = por %p2244_p2, %p2243_p1 }
   0x8   :  { %p2246_p4 = pnand %p2245_p3, %p2239_p0 }
   0xa   :  { %2249 = shalt.err (!%p2246_p4)
}
   0xb   :  { %s2275_s21 = smov 384   ;;  %s2276_s22 = smov 24  }
   0xc   :  { %27 = dma.hbm_to_vmem [thread:$0]  %s3182_s2, 6144, %s22_s19, [#allocation3], %s2275_s21, %s2275_s21, %s2276_s22  }
   0xd   :  { %2270 = dma.done.wait [#allocation3], 6144  }
   0xe   :  { %2271 = vsyncadd [#allocation3], 4294961152  ;;  %v3186_v0 = vmov 0.0   ;;  %v40_v1 = vld [vmem:[%s3181_s1 + $0x20] sm:$0xff]  ;;  %v39_v2 = vld [vmem:[%s3181_s1 + $0x18] sm:$0xff]  ;;  %vm59_vm0 = vcmask 130048   ;;  %v44_v56 = vlaneseq }
   0xf   :  { %127 = vmatprep.mubr.f32.mxu1 %v3186_v0  ;;  %334 = vmatprep.mubr.f32.mxu0 %v3186_v0  ;;  %v37_v3 = vld [vmem:[%s3181_s1 + $0x8] sm:$0xff]  ;;  %v36_v4 = vld [vmem:[%s3181_s1] sm:$0xff]  ;;  %v38_v7 = vld [vmem:[%s3181_s1 + $0x10] sm:$0xff]  ;;  %vm2278_vm1 = vmmov 0   ;;  %vm1507_vm2 = vcmask 1040384   ;;  %vm1509_vm3 = vcmask 1041408  }
  0x10   :  { %91 = vmatprep.subr.mxu1 %v40_v1  ;;  %v35_v5 = vld [vmem:[%s3180_s0] sm:$0xff]  ;;  %v41_v6 = vld [vmem:[%s3181_s1 + $0x28] sm:$0xff]  ;;  %v2343_v8 = vld [vmem:[#allocation2 + $0x170] sm:$0xff]  ;;  %v45_v57 = vshrl.u32 %v44_v56, 7  ;;  %vm1511_vm4 = vcmask 1042432   ;;  %vm1513_vm5 = vcmask 1043456  }
  0x11   :  { %92 = vmatpush1.msra.mxu1 %v39_v2  ;;  %3211 = vst [vmem:[#allocation8_spill] sm:$0xff] %v2343_v8  ;;  %v2345_v9 = vld [vmem:[#allocation2 + $0x168] sm:$0xff]  ;;  %v2347_v10 = vld [vmem:[#allocation2 + $0x178] sm:$0xff]  ;;  %270 = vmatprep.subr.mxu0 %v2343_v8  ;;  %v2353_v12 = vld [vmem:[#allocation2 + $0x150] sm:$0xff]  ;;  %vm1515_vm6 = vcmask 1044480   ;;  %vm1517_vm7 = vcmask 1045504  }
  0x12   :  { %93 = vmatprep.subr.mxu1 %v37_v3  ;;  %v2351_v11 = vld [vmem:[#allocation2 + $0x158] sm:$0xff]  ;;  %v2355_v13 = vld [vmem:[#allocation2 + $0x160] sm:$0xff]  ;;  %271 = vmatpush1.msra.mxu0 %v2345_v9  ;;  %v2361_v15 = vld [vmem:[#allocation2 + $0x148] sm:$0xff]  ;;  %v46_v58 = vsub.s32 0, %v45_v57  ;;  %v50_v61 = vsub.s32 1, %v45_v57  ;;  %vm1519_vm8 = vcmask 1046528  }
  0x13   :  { %94 = vmatpush1.msra.mxu1 %v36_v4  ;;  %v2359_v14 = vld [vmem:[#allocation2 + $0x140] sm:$0xff]  ;;  %272 = vmatprep.subr.mxu0 %v2351_v11  ;;  %v2365_v16 = vld [vmem:[#allocation2 + $0x138] sm:$0xff]  ;;  %v2369_v17 = vld [vmem:[#allocation2 + $0x128] sm:$0xff]  ;;  %s2279_s26 = smov [#allocation5]   ;;  %vm1632_vm9 = vcmask 64512  }
  0x14   :  { %1649 = vmatmul.mubr.msk.f32.vlgmr.msra.gmra.mxu1 %vm59_vm0, %v35_v5  ;;  %1806 = vmatprep.subr.mxu1 %v3186_v0  ;;  %v2371_v18 = vld [vmem:[#allocation2 + $0x130] sm:$0xff]  ;;  %v2375_v19 = vld [vmem:[#allocation2 + $0x120] sm:$0xff]  ;;  %v2381_v21 = vld [vmem:[#allocation2 + $0x118] sm:$0xff]  ;;  %s1640_s27 = sshll.u32 %s2279_s26, 4  ;;  %s1641_s27 = int_to_ptr.vmem [resolvable:$true] %s1640_s27 }
  0x15   :  { %1807 = vmatpush3.msra.mxu1 %v41_v6  ;;  %1810 = vmatprep.mubr.msk.f32.mxu1 %vm2278_vm1, %v3186_v0  ;;  %v2379_v20 = vld [vmem:[#allocation2 + $0x110] sm:$0xff]  ;;  %v2385_v22 = vld [vmem:[#allocation2 + $0x108] sm:$0xff]  ;;  %v2389_v23 = vld [vmem:[#allocation2 + $0xf8] sm:$0xff]  ;;  %s2250_s28 = scalar_lea.vmem %s1641_s27, 128  ;;  %p2255_p6 = scmp.lt.s32.totalorder %s1641_s27, %s1641_s27 }
  0x16   :  { %1808 = vmatprep.subr.mxu1 %v3186_v0  ;;  %273 = vmatpush1.msra.mxu0 %v2353_v12  ;;  %v2391_v24 = vld [vmem:[#allocation2 + $0x100] sm:$0xff]  ;;  %v2395_v25 = vld [vmem:[#allocation2 + $0xf0] sm:$0xff]  ;;  %v2401_v27 = vld [vmem:[#allocation2 + $0xe8] sm:$0xff]  ;;  %p2251_p5 = scmp.ne.s32.totalorder %s1641_s27, %s2250_s28  ;;  %p2256_p7 = scmp.lt.s32.totalorder %s2250_s28, %s2250_s28 }
  0x17   :  { %1809 = vmatpush3.msra.mxu1 %v38_v7  ;;  %274 = vmatprep.subr.mxu0 %v2359_v14  ;;  %v2399_v26 = vld [vmem:[#allocation2 + $0xe0] sm:$0xff]  ;;  %v2405_v28 = vld [vmem:[#allocation2 + $0xd8] sm:$0xff]  ;;  %v2409_v29 = vld [vmem:[#allocation2 + $0xc8] sm:$0xff] }
  0x18   :  { %1811 = vmatmul.mubr.msk.f32.vlgmr.msra.gmra.mxu1 %vm59_vm0, %v35_v5  ;;  %1813 = vmatprep.subr.mxu1 %v3186_v0  ;;  %v2411_v30 = vld [vmem:[#allocation2 + $0xd0] sm:$0xff]  ;;  %v2415_v31 = vld [vmem:[#allocation2 + $0xc0] sm:$0xff]  ;;  %v2421_v33 = vld [vmem:[#allocation2 + $0xb8] sm:$0xff]  ;;  %p2257_p8 = por %p2256_p7, %p2255_p6 }
  0x19   :  { %1845 = vmatprep.mubr.msk.f32.mxu1 %vm2278_vm1, %v3186_v0  ;;  %1814 = vmatpush3.msra.mxu1 %v2347_v10  ;;  %v2419_v32 = vld [vmem:[#allocation2 + $0xb0] sm:$0xff]  ;;  %v2425_v34 = vld [vmem:[#allocation2 + $0xa8] sm:$0xff]  ;;  %v2429_v35 = vld [vmem:[#allocation2 + $0x98] sm:$0xff] }
  0x1a   :  { %1815 = vmatprep.subr.mxu1 %v3186_v0  ;;  %275 = vmatpush1.msra.mxu0 %v2365_v16  ;;  %v2431_v36 = vld [vmem:[#allocation2 + $0xa0] sm:$0xff]  ;;  %v2435_v37 = vld [vmem:[#allocation2 + $0x90] sm:$0xff]  ;;  %v2441_v39 = vld [vmem:[#allocation2 + $0x88] sm:$0xff]  ;;  %p2258_p9 = pnand %p2257_p8, %p2251_p5 }
  0x1b   :  { %1816 = vmatpush3.msra.mxu1 %v2355_v13  ;;  %276 = vmatprep.subr.mxu0 %v2369_v17  ;;  %v2439_v38 = vld [vmem:[#allocation2 + $0x80] sm:$0xff]  ;;  %v2445_v40 = vld [vmem:[#allocation2 + $0x78] sm:$0xff]  ;;  %v2449_v41 = vld [vmem:[#allocation2 + $0x68] sm:$0xff] }
  0x1c   :  { %1817 = vmatprep.subr.mxu1 %v3186_v0  ;;  %277 = vmatpush1.msra.mxu0 %v2375_v19  ;;  %v2451_v42 = vld [vmem:[#allocation2 + $0x70] sm:$0xff]  ;;  %v2455_v43 = vld [vmem:[#allocation2 + $0x60] sm:$0xff]  ;;  %v2461_v45 = vld [vmem:[#allocation2 + $0x58] sm:$0xff] }
  0x1d   :  { %1818 = vmatpush3.msra.mxu1 %v2361_v15  ;;  %278 = vmatprep.subr.mxu0 %v2379_v20  ;;  %v2459_v44 = vld [vmem:[#allocation2 + $0x50] sm:$0xff]  ;;  %v2465_v46 = vld [vmem:[#allocation2 + $0x48] sm:$0xff]  ;;  %v2469_v47 = vld [vmem:[#allocation2 + $0x38] sm:$0xff] }
  0x1e   :  { %1819 = vmatprep.subr.mxu1 %v3186_v0  ;;  %279 = vmatpush1.msra.mxu0 %v2385_v22  ;;  %v2471_v48 = vld [vmem:[#allocation2 + $0x40] sm:$0xff]  ;;  %v2475_v49 = vld [vmem:[#allocation2 + $0x30] sm:$0xff]  ;;  %v2481_v51 = vld [vmem:[#allocation2 + $0x28] sm:$0xff] }
  0x1f   :  { %1820 = vmatpush3.msra.mxu1 %v2371_v18  ;;  %280 = vmatprep.subr.mxu0 %v2389_v23  ;;  %3212 = vst [vmem:[#allocation9_spill] sm:$0xff] %v2471_v48  ;;  %v2479_v50 = vld [vmem:[#allocation2 + $0x20] sm:$0xff]  ;;  %3214 = vst [vmem:[#allocation11_spill] sm:$0xff] %v2481_v51  ;;  %v2485_v52 = vld [vmem:[#allocation2 + $0x18] sm:$0xff] }
  0x20   :  { %1821 = vmatprep.subr.mxu1 %v3186_v0  ;;  %281 = vmatpush1.msra.mxu0 %v2395_v25  ;;  %3213 = vst [vmem:[#allocation10_spill] sm:$0xff] %v2479_v50  ;;  %3215 = vst [vmem:[#allocation12_spill] sm:$0xff] %v2485_v52  ;;  %v2489_v53 = vld [vmem:[#allocation2 + $0x8] sm:$0xff]  ;;  %v2491_v54 = vld [vmem:[#allocation2 + $0x10] sm:$0xff] }
  0x21   :  { %1822 = vmatpush3.msra.mxu1 %v2381_v21  ;;  %282 = vmatprep.subr.mxu0 %v2399_v26  ;;  %3216 = vst [vmem:[#allocation13_spill] sm:$0xff] %v2489_v53  ;;  %3217 = vst [vmem:[#allocation14_spill] sm:$0xff] %v2491_v54  ;;  %v2495_v55 = vld [vmem:[#allocation2] sm:$0xff] }
  0x22   :  { %1823 = vmatprep.subr.mxu1 %v3186_v0  ;;  %283 = vmatpush1.msra.mxu0 %v2405_v28  ;;  %3218 = vst [vmem:[#allocation15_spill] sm:$0xff] %v2495_v55  ;;  %v42_v59 = vld [vmem:[%s3183_s3] ss:$8 sm:$0x7] }
  0x23   :  { %1824 = vmatpush3.msra.mxu1 %v2391_v24  ;;  %284 = vmatprep.subr.mxu0 %v2409_v29  ;;  %v47_v60 = vrot.slane %v42_v59, %v46_v58  ;;  %v51_v3 = vrot.slane %v42_v59, %v50_v61  ;;  %v54_v58 = vsub.s32 2, %v45_v57 }
  0x24   :  { %1825 = vmatprep.subr.mxu1 %v3186_v0  ;;  %285 = vmatpush1.msra.mxu0 %v2415_v31 }
  0x25   :  { %1826 = vmatpush3.msra.mxu1 %v2401_v27  ;;  %286 = vmatprep.subr.mxu0 %v2419_v32 }
  0x26   :  { %1827 = vmatprep.subr.mxu1 %v3186_v0  ;;  %287 = vmatpush1.msra.mxu0 %v2425_v34 }
  0x27   :  { %1828 = vmatpush3.msra.mxu1 %v2411_v30  ;;  %288 = vmatprep.subr.mxu0 %v2429_v35 }
  0x28   :  { %1829 = vmatprep.subr.mxu1 %v3186_v0  ;;  %289 = vmatpush1.msra.mxu0 %v2435_v37 }
  0x29   :  { %1830 = vmatpush3.msra.mxu1 %v2421_v33  ;;  %290 = vmatprep.subr.mxu0 %v2439_v38 }
  0x2a   :  { %1831 = vmatprep.subr.mxu1 %v3186_v0  ;;  %291 = vmatpush1.msra.mxu0 %v2445_v40 }
  0x2b   :  { %1832 = vmatpush3.msra.mxu1 %v2431_v36  ;;  %292 = vmatprep.subr.mxu0 %v2449_v41 }
  0x2c   :  { %1833 = vmatprep.subr.mxu1 %v3186_v0  ;;  %293 = vmatpush1.msra.mxu0 %v2455_v43 }
  0x2d   :  { %1834 = vmatpush3.msra.mxu1 %v2441_v39  ;;  %294 = vmatprep.subr.mxu0 %v2459_v44 }
  0x2e   :  { %1835 = vmatprep.subr.mxu1 %v3186_v0  ;;  %295 = vmatpush1.msra.mxu0 %v2465_v46 }
  0x2f   :  { %1836 = vmatpush3.msra.mxu1 %v2451_v42  ;;  %296 = vmatprep.subr.mxu0 %v2469_v47 }
  0x30   :  { %1837 = vmatprep.subr.mxu1 %v3186_v0  ;;  %297 = vmatpush1.msra.mxu0 %v2475_v49 }
  0x31   :  { %1838 = vmatpush3.msra.mxu1 %v2461_v45  ;;  %298 = vmatprep.subr.mxu0 %v2479_v50 }
  0x32   :  { %1839 = vmatprep.subr.mxu1 %v3186_v0  ;;  %299 = vmatpush1.msra.mxu0 %v2485_v52 }
  0x33   :  { %1840 = vmatpush3.msra.mxu1 %v2471_v48  ;;  %300 = vmatprep.subr.mxu0 %v2489_v53 }
  0x34   :  { %1841 = vmatprep.subr.mxu1 %v3186_v0  ;;  %301 = vmatpush1.msra.mxu0 %v2495_v55 }
  0x35   :  { %1842 = vmatpush3.msra.mxu1 %v2481_v51  ;;  %448 = vmatprep.subr.mxu0 %v2343_v8 }
  0x36   :  { %1843 = vmatprep.subr.mxu1 %v3186_v0 }
  0x37   :  { %1844 = vmatpush3.msra.mxu1 %v2491_v54  ;;  %v55_v54 = vrot.slane %v42_v59, %v54_v58  ;;  %v3221_v59 = vld [vmem:[#allocation8_spill] sm:$0xff] }
  0x38   :  { %1848 = vmatprep.subr.mxu1 %v3186_v0 }
  0xd4   :  { %v129_v62 = vpop.f32.mrf.mxu1 }
  0xd5   :  { %v2507_v63 = vadd.f32 %v129_v62, %v47_v60  ;;  %v2516_v62 = vld [vmem:[%s3183_s3 + $0x1] ss:$0 sm:$0xff] }
  0xd6   :  { %v131_v1 = vpop.f32.mrf.mxu1 }
  0xd7   :  { %v1651_v2 = vmul.f32 -1.442695, %v2507_v63  ;;  %v2510_v6 = vadd.f32 %v131_v1, %v51_v3 }
  0xd8   :  { %v200_v4 = vpop.f32.mrf.mxu1 }
  0xd9   :  { %2099 = vpow2.f32 %v1651_v2  ;;  %v1652_v7 = vmul.f32 -1.442695, %v2510_v6  ;;  %v2518_v61 = vadd.f32 %v200_v4, %v55_v54  ;;  %v3220_v54 = vld [vmem:[#allocation14_spill] sm:$0xff] }
  0xda   :  { %v1812_v5 = vpop.f32.mrf.mxu1 }
  0xdb   :  { %2101 = vpow2.f32 %v1652_v7 }
  0xe6   :  { %v2100_v56 = vpop.eup %2099 }
  0xe7   :  { %v256_v0 = vadd.f32 1.0, %v2100_v56 }
  0xe8   :  { %v2102_v8 = vpop.eup %2101 }
  0xe9   :  { %2103 = vrcp.f32 %v256_v0  ;;  %v262_v60 = vadd.f32 1.0, %v2102_v8  ;;  %v3219_v8 = vmov 0.0  }
  0xeb   :  { %2105 = vrcp.f32 %v262_v60 }
  0xf6   :  { %v2104_v2 = vpop.eup %2103 }
  0xf7   :  { %v265_v1 = vmul.f32 %v2104_v2, %v2516_v62 }
  0xf8   :  { %v2106_v5 = vpop.eup %2105 }
  0xf9   :  { %v266_v3 = vadd.f32 %v265_v1, %v2518_v61  ;;  %v268_v0 = vsub.f32 1.0, %v2106_v5 }
  0xfb   :  { %2107 = vtanh.f32 %v266_v3 }
 0x108   :  { %v2108_v57 = vpop.eup %2107 }
 0x109   :  { %v2522_v7 = vmul.f32 %v2108_v57, %v268_v0 }
 0x10b   :  { %335 = vmatmul.mubr.f32.vlgmr.msra.gmra.mxu0 %v2522_v7  ;;  %1846 = vmatmul.mubr.f32.vlgmr.msra.gmra.mxu1 %v2522_v7 }
 0x10c   :  { %449 = vmatpush1.msra.mxu0 %v2345_v9  ;;  %1849 = vmatpush3.msra.mxu1 %v2347_v10 }
 0x10d   :  { %450 = vmatprep.subr.mxu0 %v2351_v11  ;;  %1850 = vmatprep.subr.mxu1 %v3219_v8 }
 0x10e   :  { %451 = vmatpush1.msra.mxu0 %v2353_v12  ;;  %1851 = vmatpush3.msra.mxu1 %v2355_v13 }
 0x10f   :  { %452 = vmatprep.subr.mxu0 %v2359_v14  ;;  %1852 = vmatprep.subr.mxu1 %v3219_v8 }
 0x110   :  { %453 = vmatpush1.msra.mxu0 %v2365_v16  ;;  %1853 = vmatpush3.msra.mxu1 %v2361_v15 }
 0x111   :  { %454 = vmatprep.subr.mxu0 %v2369_v17  ;;  %1854 = vmatprep.subr.mxu1 %v3219_v8 }
 0x112   :  { %455 = vmatpush1.msra.mxu0 %v2375_v19  ;;  %1855 = vmatpush3.msra.mxu1 %v2371_v18 }
 0x113   :  { %456 = vmatprep.subr.mxu0 %v2379_v20  ;;  %1856 = vmatprep.subr.mxu1 %v3219_v8 }
 0x114   :  { %457 = vmatpush1.msra.mxu0 %v2385_v22  ;;  %1857 = vmatpush3.msra.mxu1 %v2381_v21 }
 0x115   :  { %458 = vmatprep.subr.mxu0 %v2389_v23  ;;  %1858 = vmatprep.subr.mxu1 %v3219_v8 }
 0x116   :  { %459 = vmatpush1.msra.mxu0 %v2395_v25  ;;  %1859 = vmatpush3.msra.mxu1 %v2391_v24 }
 0x117   :  { %460 = vmatprep.subr.mxu0 %v2399_v26  ;;  %1860 = vmatprep.subr.mxu1 %v3219_v8 }
 0x118   :  { %461 = vmatpush1.msra.mxu0 %v2405_v28  ;;  %1861 = vmatpush3.msra.mxu1 %v2401_v27 }
 0x119   :  { %462 = vmatprep.subr.mxu0 %v2409_v29  ;;  %1862 = vmatprep.subr.mxu1 %v3219_v8 }
 0x11a   :  { %463 = vmatpush1.msra.mxu0 %v2415_v31  ;;  %1863 = vmatpush3.msra.mxu1 %v2411_v30 }
 0x11b   :  { %464 = vmatprep.subr.mxu0 %v2419_v32  ;;  %1864 = vmatprep.subr.mxu1 %v3219_v8 }
 0x11c   :  { %465 = vmatpush1.msra.mxu0 %v2425_v34  ;;  %1865 = vmatpush3.msra.mxu1 %v2421_v33 }
 0x11d   :  { %466 = vmatprep.subr.mxu0 %v2429_v35  ;;  %1866 = vmatprep.subr.mxu1 %v3219_v8 }
 0x11e   :  { %467 = vmatpush1.msra.mxu0 %v2435_v37  ;;  %1867 = vmatpush3.msra.mxu1 %v2431_v36 }
 0x11f   :  { %468 = vmatprep.subr.mxu0 %v2439_v38  ;;  %1868 = vmatprep.subr.mxu1 %v3219_v8 }
 0x120   :  { %469 = vmatpush1.msra.mxu0 %v2445_v40  ;;  %1869 = vmatpush3.msra.mxu1 %v2441_v39 }
 0x121   :  { %470 = vmatprep.subr.mxu0 %v2449_v41  ;;  %1870 = vmatprep.subr.mxu1 %v3219_v8 }
 0x122   :  { %471 = vmatpush1.msra.mxu0 %v2455_v43  ;;  %1871 = vmatpush3.msra.mxu1 %v2451_v42 }
 0x123   :  { %472 = vmatprep.subr.mxu0 %v2459_v44  ;;  %1872 = vmatprep.subr.mxu1 %v3219_v8 }
 0x124   :  { %473 = vmatpush1.msra.mxu0 %v2465_v46  ;;  %1873 = vmatpush3.msra.mxu1 %v2461_v45 }
 0x125   :  { %474 = vmatprep.subr.mxu0 %v2469_v47  ;;  %1874 = vmatprep.subr.mxu1 %v3219_v8 }
 0x126   :  { %475 = vmatpush1.msra.mxu0 %v2475_v49  ;;  %1875 = vmatpush3.msra.mxu1 %v2471_v48 }
 0x127   :  { %476 = vmatprep.subr.mxu0 %v2479_v50  ;;  %1876 = vmatprep.subr.mxu1 %v3219_v8 }
 0x128   :  { %477 = vmatpush1.msra.mxu0 %v2485_v52  ;;  %1877 = vmatpush3.msra.mxu1 %v2481_v51 }
 0x129   :  { %478 = vmatprep.subr.mxu0 %v2489_v53  ;;  %1878 = vmatprep.subr.mxu1 %v3219_v8 }
 0x12a   :  { %479 = vmatpush1.msra.mxu0 %v2495_v55  ;;  %512 = vmatprep.mubr.f32.mxu0 %v3219_v8 }
 0x12b   :  { %1879 = vmatpush3.msra.mxu1 %v3220_v54  ;;  %1880 = vmatprep.mubr.msk.f32.mxu1 %vm2278_vm1, %v3219_v8 }
 0x12c   :  { %625 = vmatprep.subr.mxu0 %v3221_v59  ;;  %1883 = vmatprep.subr.mxu1 %v3219_v8 }
 0x1cb   :  { %v336_v4 = vpop.f32.mrf.mxu0  ;;  %v407_v56 = vpop.f32.mrf.mxu1 }
 0x1cc   :  { %v412_v58 = vrot.slane %v336_v4, 7  ;;  %v431_v53 = vadd.f32 %v407_v56, %v2516_v62  ;;  %v3227_v56 = vld [vmem:[#allocation14_spill] sm:$0xff] }
 0x1cd   :  { %v338_v60 = vpop.f32.mrf.mxu0  ;;  %v1847_v2 = vpop.f32.mrf.mxu1 }
 0x1ce   :  { %v414_v1 = vadd.f32 %v412_v58, %v2507_v63  ;;  %v422_v5 = vrot.slane %v338_v60, 7  ;;  %v433_v52 = vrot.slane %v431_v53, 7  ;;  %v441_v2 = vrot.slane %v2522_v7, 7  ;;  %v3225_v53 = vld [vmem:[#allocation13_spill] sm:$0xff] }
 0x1d0   :  { %v1653_v3 = vmul.f32 -1.442695, %v414_v1  ;;  %v424_v0 = vadd.f32 %v422_v5, %v2510_v6 }
 0x1d2   :  { %2109 = vpow2.f32 %v1653_v3  ;;  %v1654_v57 = vmul.f32 -1.442695, %v424_v0 }
 0x1d4   :  { %2111 = vpow2.f32 %v1654_v57  ;;  %v3228_v57 = vld [vmem:[#allocation8_spill] sm:$0xff] }
 0x1df   :  { %v2110_v54 = vpop.eup %2109 }
 0x1e0   :  { %v418_v55 = vadd.f32 1.0, %v2110_v54 }
 0x1e1   :  { %v2112_v59 = vpop.eup %2111 }
 0x1e2   :  { %2113 = vrcp.f32 %v418_v55  ;;  %v428_v51 = vadd.f32 1.0, %v2112_v59  ;;  %v3226_v59 = vld [vmem:[#allocation15_spill] sm:$0xff] }
 0x1e4   :  { %2115 = vrcp.f32 %v428_v51  ;;  %v3223_v51 = vld [vmem:[#allocation12_spill] sm:$0xff] }
 0x1ef   :  { %v2114_v4 = vpop.eup %2113 }
 0x1f0   :  { %v435_v50 = vmul.f32 %v2114_v4, %v433_v52  ;;  %v3224_v52 = vld [vmem:[#allocation11_spill] sm:$0xff] }
 0x1f1   :  { %v2116_v60 = vpop.eup %2115 }
 0x1f2   :  { %v436_v58 = vadd.f32 %v435_v50, %v2518_v61  ;;  %v438_v1 = vsub.f32 1.0, %v2116_v60  ;;  %v443_v0 = vmul.f32 %v2116_v60, %v441_v2  ;;  %v3222_v50 = vld [vmem:[#allocation10_spill] sm:$0xff] }
 0x1f4   :  { %2117 = vtanh.f32 %v436_v58 }
 0x201   :  { %v2118_v3 = vpop.eup %2117 }
 0x202   :  { %v439_v5 = vmul.f32 %v2118_v3, %v438_v1 }
 0x204   :  { %v2598_v54 = vadd.f32 %v443_v0, %v439_v5 }
 0x206   :  { %v446_v55 = vrot.slane %v2598_v54, 1 }
 0x208   :  { %513 = vmatmul.mubr.f32.vlgmr.msra.gmra.mxu0 %v446_v55  ;;  %1881 = vmatmul.mubr.f32.vlgmr.msra.gmra.mxu1 %v446_v55 }
 0x209   :  { %626 = vmatpush1.msra.mxu0 %v2345_v9  ;;  %1884 = vmatpush3.msra.mxu1 %v2347_v10 }
 0x20a   :  { %627 = vmatprep.subr.mxu0 %v2351_v11  ;;  %1885 = vmatprep.subr.mxu1 %v3219_v8 }
 0x20b   :  { %628 = vmatpush1.msra.mxu0 %v2353_v12  ;;  %1886 = vmatpush3.msra.mxu1 %v2355_v13 }
 0x20c   :  { %629 = vmatprep.subr.mxu0 %v2359_v14  ;;  %1887 = vmatprep.subr.mxu1 %v3219_v8 }
 0x20d   :  { %630 = vmatpush1.msra.mxu0 %v2365_v16  ;;  %1888 = vmatpush3.msra.mxu1 %v2361_v15 }
 0x20e   :  { %631 = vmatprep.subr.mxu0 %v2369_v17  ;;  %1889 = vmatprep.subr.mxu1 %v3219_v8 }
 0x20f   :  { %632 = vmatpush1.msra.mxu0 %v2375_v19  ;;  %1890 = vmatpush3.msra.mxu1 %v2371_v18 }
 0x210   :  { %633 = vmatprep.subr.mxu0 %v2379_v20  ;;  %1891 = vmatprep.subr.mxu1 %v3219_v8 }
 0x211   :  { %634 = vmatpush1.msra.mxu0 %v2385_v22  ;;  %1892 = vmatpush3.msra.mxu1 %v2381_v21 }
 0x212   :  { %635 = vmatprep.subr.mxu0 %v2389_v23  ;;  %1893 = vmatprep.subr.mxu1 %v3219_v8 }
 0x213   :  { %636 = vmatpush1.msra.mxu0 %v2395_v25  ;;  %1894 = vmatpush3.msra.mxu1 %v2391_v24 }
 0x214   :  { %637 = vmatprep.subr.mxu0 %v2399_v26  ;;  %1895 = vmatprep.subr.mxu1 %v3219_v8 }
 0x215   :  { %638 = vmatpush1.msra.mxu0 %v2405_v28  ;;  %1896 = vmatpush3.msra.mxu1 %v2401_v27 }
 0x216   :  { %639 = vmatprep.subr.mxu0 %v2409_v29  ;;  %1897 = vmatprep.subr.mxu1 %v3219_v8 }
 0x217   :  { %640 = vmatpush1.msra.mxu0 %v2415_v31  ;;  %1898 = vmatpush3.msra.mxu1 %v2411_v30 }
 0x218   :  { %641 = vmatprep.subr.mxu0 %v2419_v32  ;;  %1899 = vmatprep.subr.mxu1 %v3219_v8 }
 0x219   :  { %642 = vmatpush1.msra.mxu0 %v2425_v34  ;;  %1900 = vmatpush3.msra.mxu1 %v2421_v33 }
 0x21a   :  { %643 = vmatprep.subr.mxu0 %v2429_v35  ;;  %1901 = vmatprep.subr.mxu1 %v3219_v8 }
 0x21b   :  { %644 = vmatpush1.msra.mxu0 %v2435_v37  ;;  %1902 = vmatpush3.msra.mxu1 %v2431_v36 }
 0x21c   :  { %645 = vmatprep.subr.mxu0 %v2439_v38  ;;  %1903 = vmatprep.subr.mxu1 %v3219_v8 }
 0x21d   :  { %646 = vmatpush1.msra.mxu0 %v2445_v40  ;;  %1904 = vmatpush3.msra.mxu1 %v2441_v39 }
 0x21e   :  { %647 = vmatprep.subr.mxu0 %v2449_v41  ;;  %1905 = vmatprep.subr.mxu1 %v3219_v8 }
 0x21f   :  { %648 = vmatpush1.msra.mxu0 %v2455_v43  ;;  %1906 = vmatpush3.msra.mxu1 %v2451_v42 }
 0x220   :  { %649 = vmatprep.subr.mxu0 %v2459_v44  ;;  %1907 = vmatprep.subr.mxu1 %v3219_v8 }
 0x221   :  { %650 = vmatpush1.msra.mxu0 %v2465_v46  ;;  %1908 = vmatpush3.msra.mxu1 %v2461_v45 }
 0x222   :  { %651 = vmatprep.subr.mxu0 %v2469_v47  ;;  %1909 = vmatprep.subr.mxu1 %v3219_v8 }
 0x223   :  { %652 = vmatpush1.msra.mxu0 %v2475_v49  ;;  %1910 = vmatpush3.msra.mxu1 %v2471_v48 }
 0x224   :  { %653 = vmatprep.subr.mxu0 %v3222_v50  ;;  %1911 = vmatprep.subr.mxu1 %v3219_v8 }
 0x225   :  { %654 = vmatpush1.msra.mxu0 %v3223_v51  ;;  %1912 = vmatpush3.msra.mxu1 %v3224_v52 }
 0x226   :  { %655 = vmatprep.subr.mxu0 %v3225_v53  ;;  %1913 = vmatprep.subr.mxu1 %v3219_v8 }
 0x227   :  { %656 = vmatpush1.msra.mxu0 %v3226_v59  ;;  %689 = vmatprep.mubr.f32.mxu0 %v3219_v8 }
 0x228   :  { %1914 = vmatpush3.msra.mxu1 %v3227_v56  ;;  %1915 = vmatprep.mubr.msk.f32.mxu1 %vm2278_vm1, %v3219_v8 }
 0x229   :  { %802 = vmatprep.subr.mxu0 %v3228_v57  ;;  %1918 = vmatprep.subr.mxu1 %v3219_v8 }
 0x2c8   :  { %v514_v4 = vpop.f32.mrf.mxu0  ;;  %v585_v58 = vpop.f32.mrf.mxu1 }
 0x2c9   :  { %v590_v60 = vrot.slane %v514_v4, 6  ;;  %v609_v52 = vadd.f32 %v585_v58, %v2516_v62  ;;  %v3233_v58 = vld [vmem:[#allocation13_spill] sm:$0xff] }
 0x2ca   :  { %v516_v2 = vpop.f32.mrf.mxu0  ;;  %v1882_v1 = vpop.f32.mrf.mxu1 }
 0x2cb   :  { %v592_v3 = vadd.f32 %v590_v60, %v2507_v63  ;;  %v600_v0 = vrot.slane %v516_v2, 6  ;;  %v611_v50 = vrot.slane %v609_v52, 6  ;;  %v1508_v52 = vsel %vm1507_vm2, %v2522_v7, %v2598_v54  ;;  %v3230_v7 = vld [vmem:[#allocation10_spill] sm:$0xff] }
 0x2cd   :  { %v1655_v5 = vmul.f32 -1.442695, %v592_v3  ;;  %v602_v55 = vadd.f32 %v600_v0, %v2510_v6  ;;  %v618_v3 = vrot.slane %v2598_v54, 7  ;;  %v3231_v54 = vld [vmem:[#allocation12_spill] sm:$0xff]  ;;  %v3234_v0 = vld [vmem:[#allocation15_spill] sm:$0xff] }
 0x2cf   :  { %2119 = vpow2.f32 %v1655_v5  ;;  %v1656_v56 = vmul.f32 -1.442695, %v602_v55  ;;  %v3235_v55 = vld [vmem:[#allocation14_spill] sm:$0xff] }
 0x2d1   :  { %2121 = vpow2.f32 %v1656_v56 }
 0x2dc   :  { %v2120_v59 = vpop.eup %2119 }
 0x2dd   :  { %v596_v53 = vadd.f32 1.0, %v2120_v59 }
 0x2de   :  { %v2122_v57 = vpop.eup %2121 }
 0x2df   :  { %2123 = vrcp.f32 %v596_v53  ;;  %v606_v51 = vadd.f32 1.0, %v2122_v57  ;;  %v3232_v57 = vld [vmem:[#allocation11_spill] sm:$0xff] }
 0x2e1   :  { %2125 = vrcp.f32 %v606_v51 }
 0x2ec   :  { %v2124_v4 = vpop.eup %2123 }
 0x2ed   :  { %v613_v48 = vmul.f32 %v2124_v4, %v611_v50  ;;  %v3236_v4 = vld [vmem:[#allocation8_spill] sm:$0xff] }
 0x2ee   :  { %v2126_v2 = vpop.eup %2125 }
 0x2ef   :  { %v614_v60 = vadd.f32 %v613_v48, %v2518_v61  ;;  %v616_v1 = vsub.f32 1.0, %v2126_v2  ;;  %v620_v59 = vmul.f32 %v2126_v2, %v618_v3  ;;  %v3229_v48 = vld [vmem:[#allocation9_spill] sm:$0xff] }
 0x2f1   :  { %2127 = vtanh.f32 %v614_v60 }
 0x2fe   :  { %v2128_v5 = vpop.eup %2127 }
 0x2ff   :  { %v617_v56 = vmul.f32 %v2128_v5, %v616_v1 }
 0x301   :  { %v2673_v53 = vadd.f32 %v620_v59, %v617_v56 }
 0x303   :  { %v623_v50 = vrot.slane %v2673_v53, 2  ;;  %v2679_v51 = vsel %vm1509_vm3, %v1508_v52, %v2673_v53 }
 0x305   :  { %690 = vmatmul.mubr.f32.vlgmr.msra.gmra.mxu0 %v623_v50  ;;  %1916 = vmatmul.mubr.f32.vlgmr.msra.gmra.mxu1 %v623_v50 }
 0x306   :  { %803 = vmatpush1.msra.mxu0 %v2345_v9  ;;  %1919 = vmatpush3.msra.mxu1 %v2347_v10 }
 0x307   :  { %804 = vmatprep.subr.mxu0 %v2351_v11  ;;  %1920 = vmatprep.subr.mxu1 %v3219_v8 }
 0x308   :  { %805 = vmatpush1.msra.mxu0 %v2353_v12  ;;  %1921 = vmatpush3.msra.mxu1 %v2355_v13 }
 0x309   :  { %806 = vmatprep.subr.mxu0 %v2359_v14  ;;  %1922 = vmatprep.subr.mxu1 %v3219_v8 }
 0x30a   :  { %807 = vmatpush1.msra.mxu0 %v2365_v16  ;;  %1923 = vmatpush3.msra.mxu1 %v2361_v15 }
 0x30b   :  { %808 = vmatprep.subr.mxu0 %v2369_v17  ;;  %1924 = vmatprep.subr.mxu1 %v3219_v8 }
 0x30c   :  { %809 = vmatpush1.msra.mxu0 %v2375_v19  ;;  %1925 = vmatpush3.msra.mxu1 %v2371_v18 }
 0x30d   :  { %810 = vmatprep.subr.mxu0 %v2379_v20  ;;  %1926 = vmatprep.subr.mxu1 %v3219_v8 }
 0x30e   :  { %811 = vmatpush1.msra.mxu0 %v2385_v22  ;;  %1927 = vmatpush3.msra.mxu1 %v2381_v21 }
 0x30f   :  { %812 = vmatprep.subr.mxu0 %v2389_v23  ;;  %1928 = vmatprep.subr.mxu1 %v3219_v8 }
 0x310   :  { %813 = vmatpush1.msra.mxu0 %v2395_v25  ;;  %1929 = vmatpush3.msra.mxu1 %v2391_v24 }
 0x311   :  { %814 = vmatprep.subr.mxu0 %v2399_v26  ;;  %1930 = vmatprep.subr.mxu1 %v3219_v8 }
 0x312   :  { %815 = vmatpush1.msra.mxu0 %v2405_v28  ;;  %1931 = vmatpush3.msra.mxu1 %v2401_v27 }
 0x313   :  { %816 = vmatprep.subr.mxu0 %v2409_v29  ;;  %1932 = vmatprep.subr.mxu1 %v3219_v8 }
 0x314   :  { %817 = vmatpush1.msra.mxu0 %v2415_v31  ;;  %1933 = vmatpush3.msra.mxu1 %v2411_v30 }
 0x315   :  { %818 = vmatprep.subr.mxu0 %v2419_v32  ;;  %1934 = vmatprep.subr.mxu1 %v3219_v8 }
 0x316   :  { %819 = vmatpush1.msra.mxu0 %v2425_v34  ;;  %1935 = vmatpush3.msra.mxu1 %v2421_v33 }
 0x317   :  { %820 = vmatprep.subr.mxu0 %v2429_v35  ;;  %1936 = vmatprep.subr.mxu1 %v3219_v8 }
 0x318   :  { %821 = vmatpush1.msra.mxu0 %v2435_v37  ;;  %1937 = vmatpush3.msra.mxu1 %v2431_v36 }
 0x319   :  { %822 = vmatprep.subr.mxu0 %v2439_v38  ;;  %1938 = vmatprep.subr.mxu1 %v3219_v8 }
 0x31a   :  { %823 = vmatpush1.msra.mxu0 %v2445_v40  ;;  %1939 = vmatpush3.msra.mxu1 %v2441_v39 }
 0x31b   :  { %824 = vmatprep.subr.mxu0 %v2449_v41  ;;  %1940 = vmatprep.subr.mxu1 %v3219_v8 }
 0x31c   :  { %825 = vmatpush1.msra.mxu0 %v2455_v43  ;;  %1941 = vmatpush3.msra.mxu1 %v2451_v42 }
 0x31d   :  { %826 = vmatprep.subr.mxu0 %v2459_v44  ;;  %1942 = vmatprep.subr.mxu1 %v3219_v8 }
 0x31e   :  { %827 = vmatpush1.msra.mxu0 %v2465_v46  ;;  %1943 = vmatpush3.msra.mxu1 %v2461_v45 }
 0x31f   :  { %828 = vmatprep.subr.mxu0 %v2469_v47  ;;  %1944 = vmatprep.subr.mxu1 %v3219_v8 }
 0x320   :  { %829 = vmatpush1.msra.mxu0 %v2475_v49  ;;  %1945 = vmatpush3.msra.mxu1 %v3229_v48 }
 0x321   :  { %830 = vmatprep.subr.mxu0 %v3230_v7  ;;  %1946 = vmatprep.subr.mxu1 %v3219_v8 }
 0x322   :  { %831 = vmatpush1.msra.mxu0 %v3231_v54  ;;  %1947 = vmatpush3.msra.mxu1 %v3232_v57 }
 0x323   :  { %832 = vmatprep.subr.mxu0 %v3233_v58  ;;  %1948 = vmatprep.subr.mxu1 %v3219_v8 }
 0x324   :  { %833 = vmatpush1.msra.mxu0 %v3234_v0  ;;  %866 = vmatprep.mubr.f32.mxu0 %v3219_v8 }
 0x325   :  { %1949 = vmatpush3.msra.mxu1 %v3235_v55  ;;  %1950 = vmatprep.mubr.msk.f32.mxu1 %vm2278_vm1, %v3219_v8 }
 0x326   :  { %979 = vmatprep.subr.mxu0 %v3236_v4  ;;  %1953 = vmatprep.subr.mxu1 %v3219_v8 }
 0x3c5   :  { %v691_v60 = vpop.f32.mrf.mxu0  ;;  %v762_v2 = vpop.f32.mrf.mxu1 }
 0x3c6   :  { %v767_v1 = vrot.slane %v691_v60, 5  ;;  %v786_v57 = vadd.f32 %v762_v2, %v2516_v62  ;;  %v2871_v2 = vld [vmem:[#allocation2 + $0x120] sm:$0xff] }
 0x3c7   :  { %v693_v3 = vpop.f32.mrf.mxu0  ;;  %v1917_v5 = vpop.f32.mrf.mxu1 }
 0x3c8   :  { %v769_v56 = vadd.f32 %v767_v1, %v2507_v63  ;;  %v777_v52 = vrot.slane %v693_v3, 5  ;;  %v788_v7 = vrot.slane %v786_v57, 5 }
 0x3ca   :  { %v1657_v59 = vmul.f32 -1.442695, %v769_v56  ;;  %v779_v50 = vadd.f32 %v777_v52, %v2510_v6  ;;  %v795_v56 = vrot.slane %v2673_v53, 7  ;;  %v2854_v53 = vld [vmem:[#allocation2 + $0x160] sm:$0xff] }
 0x3cc   :  { %2129 = vpow2.f32 %v1657_v59  ;;  %v1658_v55 = vmul.f32 -1.442695, %v779_v50  ;;  %v2874_v50 = vld [vmem:[#allocation2 + $0x130] sm:$0xff] }
 0x3ce   :  { %2131 = vpow2.f32 %v1658_v55 }
 0x3d9   :  { %v2130_v0 = vpop.eup %2129 }
 0x3da   :  { %v773_v58 = vadd.f32 1.0, %v2130_v0 }
 0x3db   :  { %v2132_v4 = vpop.eup %2131 }
 0x3dc   :  { %2133 = vrcp.f32 %v773_v58  ;;  %v783_v54 = vadd.f32 1.0, %v2132_v4  ;;  %v2877_v4 = vld [vmem:[#allocation2 + $0x110] sm:$0xff] }
 0x3de   :  { %2135 = vrcp.f32 %v783_v54  ;;  %v2867_v54 = vld [vmem:[#allocation2 + $0x128] sm:$0xff] }
 0x3e9   :  { %v2134_v60 = vpop.eup %2133 }
 0x3ea   :  { %v790_v48 = vmul.f32 %v2134_v60, %v788_v7  ;;  %v2864_v7 = vld [vmem:[#allocation2 + $0x148] sm:$0xff] }
 0x3eb   :  { %v2136_v3 = vpop.eup %2135  ;;  %v2881_v60 = vld [vmem:[#allocation2 + $0x108] sm:$0xff] }
 0x3ec   :  { %v791_v1 = vadd.f32 %v790_v48, %v2518_v61  ;;  %v793_v5 = vsub.f32 1.0, %v2136_v3  ;;  %v797_v52 = vmul.f32 %v2136_v3, %v795_v56  ;;  %v2861_v48 = vld [vmem:[#allocation2 + $0x138] sm:$0xff]  ;;  %v2894_v56 = vld [vmem:[#allocation2 + $0x100] sm:$0xff] }
 0x3ed   :  { %v2887_v3 = vld [vmem:[#allocation2 + $0xf8] sm:$0xff] }
 0x3ee   :  { %2137 = vtanh.f32 %v791_v1  ;;  %v2884_v1 = vld [vmem:[#allocation2 + $0x118] sm:$0xff] }
 0x3fb   :  { %v2138_v59 = vpop.eup %2137 }
 0x3fc   :  { %v794_v55 = vmul.f32 %v2138_v59, %v793_v5  ;;  %v2891_v5 = vld [vmem:[#allocation2 + $0xf0] sm:$0xff]  ;;  %v2897_v59 = vld [vmem:[#allocation2 + $0xe0] sm:$0xff] }
 0x3fe   :  { %v2753_v58 = vadd.f32 %v797_v52, %v794_v55  ;;  %v2901_v55 = vld [vmem:[#allocation2 + $0xd8] sm:$0xff]  ;;  %v2904_v52 = vld [vmem:[#allocation2 + $0xe8] sm:$0xff] }
 0x400   :  { %v800_v0 = vrot.slane %v2753_v58, 3  ;;  %v2758_v57 = vsel %vm1511_vm4, %v2679_v51, %v2753_v58  ;;  %v2857_v51 = vld [vmem:[#allocation2 + $0x140] sm:$0xff] }
 0x402   :  { %867 = vmatmul.mubr.f32.vlgmr.msra.gmra.mxu0 %v800_v0  ;;  %1951 = vmatmul.mubr.f32.vlgmr.msra.gmra.mxu1 %v800_v0  ;;  %v2911_v0 = vld [vmem:[#allocation2 + $0xc0] sm:$0xff] }
 0x403   :  { %980 = vmatpush1.msra.mxu0 %v2345_v9  ;;  %1954 = vmatpush3.msra.mxu1 %v2347_v10  ;;  %v3237_v9 = vld [vmem:[#allocation9_spill] sm:$0xff]  ;;  %v3238_v10 = vld [vmem:[#allocation10_spill] sm:$0xff] }
 0x404   :  { %981 = vmatprep.subr.mxu0 %v2351_v11  ;;  %1955 = vmatprep.subr.mxu1 %v3219_v8  ;;  %v3239_v11 = vld [vmem:[#allocation12_spill] sm:$0xff] }
 0x405   :  { %982 = vmatpush1.msra.mxu0 %v2353_v12  ;;  %1956 = vmatpush3.msra.mxu1 %v2355_v13  ;;  %v3240_v12 = vld [vmem:[#allocation11_spill] sm:$0xff]  ;;  %v3241_v13 = vld [vmem:[#allocation13_spill] sm:$0xff] }
 0x406   :  { %983 = vmatprep.subr.mxu0 %v2359_v14  ;;  %1957 = vmatprep.subr.mxu1 %v3219_v8  ;;  %v3242_v14 = vld [vmem:[#allocation15_spill] sm:$0xff] }
 0x407   :  { %984 = vmatpush1.msra.mxu0 %v2365_v16  ;;  %1958 = vmatpush3.msra.mxu1 %v2361_v15  ;;  %v3243_v15 = vld [vmem:[#allocation14_spill] sm:$0xff]  ;;  %v2825_v16 = vld [vmem:[#allocation2 + $0x170] sm:$0xff] }
 0x408   :  { %985 = vmatprep.subr.mxu0 %v2369_v17  ;;  %1959 = vmatprep.subr.mxu1 %v3219_v8 }
 0x409   :  { %986 = vmatpush1.msra.mxu0 %v2375_v19  ;;  %1960 = vmatpush3.msra.mxu1 %v2371_v18 }
 0x40a   :  { %987 = vmatprep.subr.mxu0 %v2379_v20  ;;  %1961 = vmatprep.subr.mxu1 %v3219_v8 }
 0x40b   :  { %988 = vmatpush1.msra.mxu0 %v2385_v22  ;;  %1962 = vmatpush3.msra.mxu1 %v2381_v21 }
 0x40c   :  { %989 = vmatprep.subr.mxu0 %v2389_v23  ;;  %1963 = vmatprep.subr.mxu1 %v3219_v8 }
 0x40d   :  { %990 = vmatpush1.msra.mxu0 %v2395_v25  ;;  %1964 = vmatpush3.msra.mxu1 %v2391_v24 }
 0x40e   :  { %991 = vmatprep.subr.mxu0 %v2399_v26  ;;  %1965 = vmatprep.subr.mxu1 %v3219_v8 }
 0x40f   :  { %992 = vmatpush1.msra.mxu0 %v2405_v28  ;;  %1966 = vmatpush3.msra.mxu1 %v2401_v27 }
 0x410   :  { %993 = vmatprep.subr.mxu0 %v2409_v29  ;;  %1967 = vmatprep.subr.mxu1 %v3219_v8 }
 0x411   :  { %994 = vmatpush1.msra.mxu0 %v2415_v31  ;;  %1968 = vmatpush3.msra.mxu1 %v2411_v30 }
 0x412   :  { %995 = vmatprep.subr.mxu0 %v2419_v32  ;;  %1969 = vmatprep.subr.mxu1 %v3219_v8 }
 0x413   :  { %996 = vmatpush1.msra.mxu0 %v2425_v34  ;;  %1970 = vmatpush3.msra.mxu1 %v2421_v33 }
 0x414   :  { %997 = vmatprep.subr.mxu0 %v2429_v35  ;;  %1971 = vmatprep.subr.mxu1 %v3219_v8 }
 0x415   :  { %998 = vmatpush1.msra.mxu0 %v2435_v37  ;;  %1972 = vmatpush3.msra.mxu1 %v2431_v36 }
 0x416   :  { %999 = vmatprep.subr.mxu0 %v2439_v38  ;;  %1973 = vmatprep.subr.mxu1 %v3219_v8  ;;  %v972_v38 = vrot.slane %v2753_v58, 7  ;;  %v2907_v58 = vld [vmem:[#allocation2 + $0xc8] sm:$0xff] }
 0x417   :  { %1000 = vmatpush1.msra.mxu0 %v2445_v40  ;;  %1974 = vmatpush3.msra.mxu1 %v2441_v39 }
 0x418   :  { %1001 = vmatprep.subr.mxu0 %v2449_v41  ;;  %1975 = vmatprep.subr.mxu1 %v3219_v8 }
 0x419   :  { %1002 = vmatpush1.msra.mxu0 %v2455_v43  ;;  %1976 = vmatpush3.msra.mxu1 %v2451_v42 }
 0x41a   :  { %1003 = vmatprep.subr.mxu0 %v2459_v44  ;;  %1977 = vmatprep.subr.mxu1 %v3219_v8 }
 0x41b   :  { %1004 = vmatpush1.msra.mxu0 %v2465_v46  ;;  %1978 = vmatpush3.msra.mxu1 %v2461_v45  ;;  %v2841_v45 = vld [vmem:[#allocation2 + $0x168] sm:$0xff]  ;;  %v2844_v46 = vld [vmem:[#allocation2 + $0x178] sm:$0xff] }
 0x41c   :  { %1005 = vmatprep.subr.mxu0 %v2469_v47  ;;  %1979 = vmatprep.subr.mxu1 %v3219_v8  ;;  %v2847_v47 = vld [vmem:[#allocation2 + $0x158] sm:$0xff] }
 0x41d   :  { %1006 = vmatpush1.msra.mxu0 %v2475_v49  ;;  %1980 = vmatpush3.msra.mxu1 %v3237_v9  ;;  %v2851_v49 = vld [vmem:[#allocation2 + $0x150] sm:$0xff] }
 0x41e   :  { %1007 = vmatprep.subr.mxu0 %v3238_v10  ;;  %1981 = vmatprep.subr.mxu1 %v3219_v8  ;;  %v2917_v9 = vld [vmem:[#allocation2 + $0xb0] sm:$0xff]  ;;  %v2921_v10 = vld [vmem:[#allocation2 + $0xa8] sm:$0xff] }
 0x41f   :  { %1008 = vmatpush1.msra.mxu0 %v3239_v11  ;;  %1982 = vmatpush3.msra.mxu1 %v3240_v12  ;;  %v2924_v11 = vld [vmem:[#allocation2 + $0xb8] sm:$0xff] }
 0x420   :  { %1009 = vmatprep.subr.mxu0 %v3241_v13  ;;  %1983 = vmatprep.subr.mxu1 %v3219_v8  ;;  %v2927_v12 = vld [vmem:[#allocation2 + $0x98] sm:$0xff]  ;;  %v2931_v13 = vld [vmem:[#allocation2 + $0x90] sm:$0xff] }
 0x421   :  { %1010 = vmatpush1.msra.mxu0 %v3242_v14  ;;  %1043 = vmatprep.mubr.f32.mxu0 %v3219_v8  ;;  %v2934_v14 = vld [vmem:[#allocation2 + $0xa0] sm:$0xff] }
 0x422   :  { %1984 = vmatpush3.msra.mxu1 %v3243_v15  ;;  %1985 = vmatprep.mubr.msk.f32.mxu1 %vm2278_vm1, %v3219_v8  ;;  %v2937_v15 = vld [vmem:[#allocation2 + $0x80] sm:$0xff] }
 0x423   :  { %1156 = vmatprep.subr.mxu0 %v2825_v16  ;;  %1988 = vmatprep.subr.mxu1 %v3219_v8 }
 0x4c2   :  { %v868_v17 = vpop.f32.mrf.mxu0  ;;  %v939_v18 = vpop.f32.mrf.mxu1 }
 0x4c3   :  { %v944_v19 = vrot.slane %v868_v17, 4  ;;  %v963_v30 = vadd.f32 %v939_v18, %v2516_v62  ;;  %v2941_v17 = vld [vmem:[#allocation2 + $0x78] sm:$0xff]  ;;  %v2944_v18 = vld [vmem:[#allocation2 + $0x88] sm:$0xff] }
 0x4c4   :  { %v870_v20 = vpop.f32.mrf.mxu0  ;;  %v1952_v21 = vpop.f32.mrf.mxu1 }
 0x4c5   :  { %v946_v22 = vadd.f32 %v944_v19, %v2507_v63  ;;  %v954_v24 = vrot.slane %v870_v20, 4  ;;  %v965_v32 = vrot.slane %v963_v30, 4  ;;  %v2947_v19 = vld [vmem:[#allocation2 + $0x68] sm:$0xff]  ;;  %v2951_v20 = vld [vmem:[#allocation2 + $0x60] sm:$0xff]  ;;  %v2954_v21 = vld [vmem:[#allocation2 + $0x70] sm:$0xff] }
 0x4c6   :  { %v2984_v30 = vld [vmem:[#allocation2 + $0x28] sm:$0xff] }
 0x4c7   :  { %v1659_v23 = vmul.f32 -1.442695, %v946_v22  ;;  %v956_v25 = vadd.f32 %v954_v24, %v2510_v6  ;;  %v2957_v22 = vld [vmem:[#allocation2 + $0x50] sm:$0xff]  ;;  %v2964_v24 = vld [vmem:[#allocation2 + $0x58] sm:$0xff]  ;;  %3247 = vst [vmem:[#allocation12_spill] sm:$0xff] %v2984_v30 }
 0x4c9   :  { %2139 = vpow2.f32 %v1659_v23  ;;  %v1660_v26 = vmul.f32 -1.442695, %v956_v25  ;;  %v2961_v23 = vld [vmem:[#allocation2 + $0x48] sm:$0xff]  ;;  %v2967_v25 = vld [vmem:[#allocation2 + $0x38] sm:$0xff] }
 0x4cb   :  { %2141 = vpow2.f32 %v1660_v26  ;;  %v2971_v26 = vld [vmem:[#allocation2 + $0x30] sm:$0xff] }
 0x4d6   :  { %v2140_v27 = vpop.eup %2139 }
 0x4d7   :  { %v950_v28 = vadd.f32 1.0, %v2140_v27  ;;  %v2974_v27 = vld [vmem:[#allocation2 + $0x40] sm:$0xff] }
 0x4d8   :  { %v2142_v29 = vpop.eup %2141  ;;  %3244 = vst [vmem:[#allocation8_spill] sm:$0xff] %v2974_v27 }
 0x4d9   :  { %2143 = vrcp.f32 %v950_v28  ;;  %v960_v31 = vadd.f32 1.0, %v2142_v29  ;;  %v2977_v28 = vld [vmem:[#allocation2 + $0x20] sm:$0xff]  ;;  %v2981_v29 = vld [vmem:[#allocation2 + $0x18] sm:$0xff] }
 0x4da   :  { %3245 = vst [vmem:[#allocation9_spill] sm:$0xff] %v2977_v28  ;;  %3246 = vst [vmem:[#allocation10_spill] sm:$0xff] %v2981_v29 }
 0x4db   :  { %2145 = vrcp.f32 %v960_v31  ;;  %v2987_v31 = vld [vmem:[#allocation2 + $0x8] sm:$0xff] }
 0x4dc   :  { %3248 = vst [vmem:[#allocation11_spill] sm:$0xff] %v2987_v31 }
 0x4e6   :  { %v2144_v33 = vpop.eup %2143 }
 0x4e7   :  { %v967_v34 = vmul.f32 %v2144_v33, %v965_v32  ;;  %v2991_v32 = vld [vmem:[#allocation2] sm:$0xff]  ;;  %v2995_v33 = vld [vmem:[#allocation2 + $0x10] sm:$0xff] }
 0x4e8   :  { %v2146_v36 = vpop.eup %2145  ;;  %3249 = vst [vmem:[#allocation13_spill] sm:$0xff] %v2991_v32  ;;  %3250 = vst [vmem:[#allocation15_spill] sm:$0xff] %v2995_v33 }
 0x4e9   :  { %v968_v35 = vadd.f32 %v967_v34, %v2518_v61  ;;  %v970_v37 = vsub.f32 1.0, %v2146_v36  ;;  %v974_v41 = vmul.f32 %v2146_v36, %v972_v38 }
 0x4eb   :  { %2147 = vtanh.f32 %v968_v35 }
 0x4f8   :  { %v2148_v39 = vpop.eup %2147 }
 0x4f9   :  { %v971_v40 = vmul.f32 %v2148_v39, %v970_v37 }
 0x4fb   :  { %v2834_v42 = vadd.f32 %v974_v41, %v971_v40 }
 0x4fd   :  { %v977_v43 = vrot.slane %v2834_v42, 4  ;;  %v2839_v44 = vsel %vm1513_vm5, %v2758_v57, %v2834_v42  ;;  %v2914_v57 = vld [vmem:[#allocation2 + $0xd0] sm:$0xff] }
 0x4ff   :  { %1044 = vmatmul.mubr.f32.vlgmr.msra.gmra.mxu0 %v977_v43  ;;  %1986 = vmatmul.mubr.f32.vlgmr.msra.gmra.mxu1 %v977_v43 }
 0x500   :  { %1157 = vmatpush1.msra.mxu0 %v2841_v45  ;;  %1989 = vmatpush3.msra.mxu1 %v2844_v46 }
 0x501   :  { %1158 = vmatprep.subr.mxu0 %v2847_v47  ;;  %1990 = vmatprep.subr.mxu1 %v3219_v8 }
 0x502   :  { %1159 = vmatpush1.msra.mxu0 %v2851_v49  ;;  %1991 = vmatpush3.msra.mxu1 %v2854_v53 }
 0x503   :  { %1160 = vmatprep.subr.mxu0 %v2857_v51  ;;  %1992 = vmatprep.subr.mxu1 %v3219_v8 }
 0x504   :  { %1161 = vmatpush1.msra.mxu0 %v2861_v48  ;;  %1993 = vmatpush3.msra.mxu1 %v2864_v7 }
 0x505   :  { %1162 = vmatprep.subr.mxu0 %v2867_v54  ;;  %1994 = vmatprep.subr.mxu1 %v3219_v8 }
 0x506   :  { %1163 = vmatpush1.msra.mxu0 %v2871_v2  ;;  %1995 = vmatpush3.msra.mxu1 %v2874_v50 }
 0x507   :  { %1164 = vmatprep.subr.mxu0 %v2877_v4  ;;  %1996 = vmatprep.subr.mxu1 %v3219_v8 }
 0x508   :  { %1165 = vmatpush1.msra.mxu0 %v2881_v60  ;;  %1997 = vmatpush3.msra.mxu1 %v2884_v1 }
 0x509   :  { %1166 = vmatprep.subr.mxu0 %v2887_v3  ;;  %1998 = vmatprep.subr.mxu1 %v3219_v8 }
 0x50a   :  { %1167 = vmatpush1.msra.mxu0 %v2891_v5  ;;  %1999 = vmatpush3.msra.mxu1 %v2894_v56 }
 0x50b   :  { %1168 = vmatprep.subr.mxu0 %v2897_v59  ;;  %2000 = vmatprep.subr.mxu1 %v3219_v8 }
 0x50c   :  { %1169 = vmatpush1.msra.mxu0 %v2901_v55  ;;  %2001 = vmatpush3.msra.mxu1 %v2904_v52 }
 0x50d   :  { %1170 = vmatprep.subr.mxu0 %v2907_v58  ;;  %2002 = vmatprep.subr.mxu1 %v3219_v8 }
 0x50e   :  { %1171 = vmatpush1.msra.mxu0 %v2911_v0  ;;  %2003 = vmatpush3.msra.mxu1 %v2914_v57 }
 0x50f   :  { %1172 = vmatprep.subr.mxu0 %v2917_v9  ;;  %2004 = vmatprep.subr.mxu1 %v3219_v8 }
 0x510   :  { %1173 = vmatpush1.msra.mxu0 %v2921_v10  ;;  %2005 = vmatpush3.msra.mxu1 %v2924_v11 }
 0x511   :  { %1174 = vmatprep.subr.mxu0 %v2927_v12  ;;  %2006 = vmatprep.subr.mxu1 %v3219_v8 }
 0x512   :  { %1175 = vmatpush1.msra.mxu0 %v2931_v13  ;;  %2007 = vmatpush3.msra.mxu1 %v2934_v14 }
 0x513   :  { %1176 = vmatprep.subr.mxu0 %v2937_v15  ;;  %2008 = vmatprep.subr.mxu1 %v3219_v8 }
 0x514   :  { %1177 = vmatpush1.msra.mxu0 %v2941_v17  ;;  %2009 = vmatpush3.msra.mxu1 %v2944_v18 }
 0x515   :  { %1178 = vmatprep.subr.mxu0 %v2947_v19  ;;  %2010 = vmatprep.subr.mxu1 %v3219_v8 }
 0x516   :  { %1179 = vmatpush1.msra.mxu0 %v2951_v20  ;;  %2011 = vmatpush3.msra.mxu1 %v2954_v21 }
 0x517   :  { %1180 = vmatprep.subr.mxu0 %v2957_v22  ;;  %2012 = vmatprep.subr.mxu1 %v3219_v8 }
 0x518   :  { %1181 = vmatpush1.msra.mxu0 %v2961_v23  ;;  %2013 = vmatpush3.msra.mxu1 %v2964_v24 }
 0x519   :  { %1182 = vmatprep.subr.mxu0 %v2967_v25  ;;  %2014 = vmatprep.subr.mxu1 %v3219_v8 }
 0x51a   :  { %1183 = vmatpush1.msra.mxu0 %v2971_v26  ;;  %2015 = vmatpush3.msra.mxu1 %v2974_v27 }
 0x51b   :  { %1184 = vmatprep.subr.mxu0 %v2977_v28  ;;  %2016 = vmatprep.subr.mxu1 %v3219_v8 }
 0x51c   :  { %1185 = vmatpush1.msra.mxu0 %v2981_v29  ;;  %2017 = vmatpush3.msra.mxu1 %v2984_v30 }
 0x51d   :  { %1186 = vmatprep.subr.mxu0 %v2987_v31  ;;  %2018 = vmatprep.subr.mxu1 %v3219_v8 }
 0x51e   :  { %1187 = vmatpush1.msra.mxu0 %v2991_v32  ;;  %1220 = vmatprep.mubr.f32.mxu0 %v3219_v8 }
 0x51f   :  { %2019 = vmatpush3.msra.mxu1 %v2995_v33  ;;  %2020 = vmatprep.mubr.msk.f32.mxu1 %vm2278_vm1, %v3219_v8 }
 0x520   :  { %1333 = vmatprep.subr.mxu0 %v2825_v16  ;;  %2023 = vmatprep.subr.mxu1 %v3219_v8 }
 0x5bf   :  { %v1045_v34 = vpop.f32.mrf.mxu0  ;;  %v1116_v35 = vpop.f32.mrf.mxu1 }
 0x5c0   :  { %v1121_v36 = vrot.slane %v1045_v34, 3  ;;  %v1140_v30 = vadd.f32 %v1116_v35, %v2516_v62  ;;  %v1550_v35 = vld [vmem:[%s3184_s4 + $0x28] sm:$0xff] }
 0x5c1   :  { %v1047_v37 = vpop.f32.mrf.mxu0  ;;  %v1987_v38 = vpop.f32.mrf.mxu1 }
 0x5c2   :  { %v1123_v39 = vadd.f32 %v1121_v36, %v2507_v63  ;;  %v1131_v41 = vrot.slane %v1047_v37, 3  ;;  %v1142_v28 = vrot.slane %v1140_v30, 3 }
 0x5c4   :  { %v1661_v40 = vmul.f32 -1.442695, %v1123_v39  ;;  %v1133_v43 = vadd.f32 %v1131_v41, %v2510_v6  ;;  %v1149_v39 = vrot.slane %v2834_v42, 7  ;;  %v3251_v42 = vld [vmem:[#allocation8_spill] sm:$0xff] }
 0x5c6   :  { %2149 = vpow2.f32 %v1661_v40  ;;  %v1662_v33 = vmul.f32 -1.442695, %v1133_v43  ;;  %v1549_v43 = vld [vmem:[%s3184_s4 + $0x20] sm:$0xff] }
 0x5c8   :  { %2151 = vpow2.f32 %v1662_v33 }
 0x5d3   :  { %v2150_v32 = vpop.eup %2149 }
 0x5d4   :  { %v1127_v31 = vadd.f32 1.0, %v2150_v32  ;;  %v1551_v32 = vld [vmem:[%s3184_s4 + $0x30] sm:$0xff] }
 0x5d5   :  { %v2152_v16 = vpop.eup %2151 }
 0x5d6   :  { %2153 = vrcp.f32 %v1127_v31  ;;  %v1137_v29 = vadd.f32 1.0, %v2152_v16  ;;  %v1548_v16 = vld [vmem:[%s3184_s4 + $0x18] sm:$0xff] }
 0x5d8   :  { %2155 = vrcp.f32 %v1137_v29  ;;  %v1552_v29 = vld [vmem:[%s3184_s4 + $0x38] sm:$0xff] }
 0x5e3   :  { %v2154_v34 = vpop.eup %2153 }
 0x5e4   :  { %v1144_v27 = vmul.f32 %v2154_v34, %v1142_v28  ;;  %v1553_v28 = vld [vmem:[%s3184_s4 + $0x40] sm:$0xff]  ;;  %v1547_v34 = vld [vmem:[%s3184_s4 + $0x10] sm:$0xff] }
 0x5e5   :  { %v2156_v37 = vpop.eup %2155 }
 0x5e6   :  { %v1145_v36 = vadd.f32 %v1144_v27, %v2518_v61  ;;  %v1147_v38 = vsub.f32 1.0, %v2156_v37  ;;  %v1151_v41 = vmul.f32 %v2156_v37, %v1149_v39  ;;  %v1554_v27 = vld [vmem:[%s3184_s4 + $0x48] sm:$0xff]  ;;  %v1545_v37 = vld [vmem:[%s3184_s4] sm:$0xff] }
 0x5e8   :  { %2157 = vtanh.f32 %v1145_v36  ;;  %v1546_v36 = vld [vmem:[%s3184_s4 + $0x8] sm:$0xff] }
 0x5f5   :  { %v2158_v40 = vpop.eup %2157 }
 0x5f6   :  { %v1148_v33 = vmul.f32 %v2158_v40, %v1147_v38 }
 0x5f8   :  { %v3007_v31 = vadd.f32 %v1151_v41, %v1148_v33 }
 0x5fa   :  { %v1154_v62 = vrot.slane %v3007_v31, 5  ;;  %v3012_v30 = vsel %vm1515_vm6, %v2839_v44, %v3007_v31  ;;  %v3252_v44 = vld [vmem:[#allocation9_spill] sm:$0xff] }
 0x5fc   :  { %1221 = vmatmul.mubr.f32.vlgmr.msra.gmra.mxu0 %v1154_v62  ;;  %2021 = vmatmul.mubr.f32.vlgmr.msra.gmra.mxu1 %v1154_v62 }
 0x5fd   :  { %1334 = vmatpush1.msra.mxu0 %v2841_v45  ;;  %2024 = vmatpush3.msra.mxu1 %v2844_v46  ;;  %v3253_v45 = vld [vmem:[#allocation10_spill] sm:$0xff]  ;;  %v3254_v46 = vld [vmem:[#allocation12_spill] sm:$0xff] }
 0x5fe   :  { %1335 = vmatprep.subr.mxu0 %v2847_v47  ;;  %2025 = vmatprep.subr.mxu1 %v3219_v8  ;;  %v3255_v47 = vld [vmem:[#allocation11_spill] sm:$0xff] }
 0x5ff   :  { %1336 = vmatpush1.msra.mxu0 %v2851_v49  ;;  %2026 = vmatpush3.msra.mxu1 %v2854_v53  ;;  %v3256_v49 = vld [vmem:[#allocation13_spill] sm:$0xff]  ;;  %v3257_v53 = vld [vmem:[#allocation15_spill] sm:$0xff] }
 0x600   :  { %1337 = vmatprep.subr.mxu0 %v2857_v51  ;;  %2027 = vmatprep.subr.mxu1 %v3219_v8 }
 0x601   :  { %1338 = vmatpush1.msra.mxu0 %v2861_v48  ;;  %2028 = vmatpush3.msra.mxu1 %v2864_v7 }
 0x602   :  { %1339 = vmatprep.subr.mxu0 %v2867_v54  ;;  %2029 = vmatprep.subr.mxu1 %v3219_v8 }
 0x603   :  { %1340 = vmatpush1.msra.mxu0 %v2871_v2  ;;  %2030 = vmatpush3.msra.mxu1 %v2874_v50 }
 0x604   :  { %1341 = vmatprep.subr.mxu0 %v2877_v4  ;;  %2031 = vmatprep.subr.mxu1 %v3219_v8 }
 0x605   :  { %1342 = vmatpush1.msra.mxu0 %v2881_v60  ;;  %2032 = vmatpush3.msra.mxu1 %v2884_v1 }
 0x606   :  { %1343 = vmatprep.subr.mxu0 %v2887_v3  ;;  %2033 = vmatprep.subr.mxu1 %v3219_v8 }
 0x607   :  { %1344 = vmatpush1.msra.mxu0 %v2891_v5  ;;  %2034 = vmatpush3.msra.mxu1 %v2894_v56 }
 0x608   :  { %1345 = vmatprep.subr.mxu0 %v2897_v59  ;;  %2035 = vmatprep.subr.mxu1 %v3219_v8 }
 0x609   :  { %1346 = vmatpush1.msra.mxu0 %v2901_v55  ;;  %2036 = vmatpush3.msra.mxu1 %v2904_v52  ;;  %v3085_v55 = vld [vmem:[%s3183_s3 + $0x1] ss:$0 sm:$0xff] }
 0x60a   :  { %1347 = vmatprep.subr.mxu0 %v2907_v58  ;;  %2037 = vmatprep.subr.mxu1 %v3219_v8 }
 0x60b   :  { %1348 = vmatpush1.msra.mxu0 %v2911_v0  ;;  %2038 = vmatpush3.msra.mxu1 %v2914_v57 }
 0x60c   :  { %1349 = vmatprep.subr.mxu0 %v2917_v9  ;;  %2039 = vmatprep.subr.mxu1 %v3219_v8 }
 0x60d   :  { %1350 = vmatpush1.msra.mxu0 %v2921_v10  ;;  %2040 = vmatpush3.msra.mxu1 %v2924_v11 }
 0x60e   :  { %1351 = vmatprep.subr.mxu0 %v2927_v12  ;;  %2041 = vmatprep.subr.mxu1 %v3219_v8 }
 0x60f   :  { %1352 = vmatpush1.msra.mxu0 %v2931_v13  ;;  %2042 = vmatpush3.msra.mxu1 %v2934_v14  ;;  %v1326_v13 = vrot.slane %v3007_v31, 7 }
 0x610   :  { %1353 = vmatprep.subr.mxu0 %v2937_v15  ;;  %2043 = vmatprep.subr.mxu1 %v3219_v8 }
 0x611   :  { %1354 = vmatpush1.msra.mxu0 %v2941_v17  ;;  %2044 = vmatpush3.msra.mxu1 %v2944_v18 }
 0x612   :  { %1355 = vmatprep.subr.mxu0 %v2947_v19  ;;  %2045 = vmatprep.subr.mxu1 %v3219_v8 }
 0x613   :  { %1356 = vmatpush1.msra.mxu0 %v2951_v20  ;;  %2046 = vmatpush3.msra.mxu1 %v2954_v21  ;;  %v1560_v21 = vld [vmem:[%s3184_s4 + $0x78] sm:$0xff] }
 0x614   :  { %1357 = vmatprep.subr.mxu0 %v2957_v22  ;;  %2047 = vmatprep.subr.mxu1 %v3219_v8  ;;  %v1559_v22 = vld [vmem:[%s3184_s4 + $0x70] sm:$0xff] }
 0x615   :  { %1358 = vmatpush1.msra.mxu0 %v2961_v23  ;;  %2048 = vmatpush3.msra.mxu1 %v2964_v24  ;;  %v1558_v23 = vld [vmem:[%s3184_s4 + $0x68] sm:$0xff]  ;;  %v1557_v24 = vld [vmem:[%s3184_s4 + $0x60] sm:$0xff] }
 0x616   :  { %1359 = vmatprep.subr.mxu0 %v2967_v25  ;;  %2049 = vmatprep.subr.mxu1 %v3219_v8  ;;  %v1556_v25 = vld [vmem:[%s3184_s4 + $0x58] sm:$0xff] }
 0x617   :  { %1360 = vmatpush1.msra.mxu0 %v2971_v26  ;;  %2050 = vmatpush3.msra.mxu1 %v3251_v42  ;;  %v1555_v26 = vld [vmem:[%s3184_s4 + $0x50] sm:$0xff] }
 0x618   :  { %1361 = vmatprep.subr.mxu0 %v3252_v44  ;;  %2051 = vmatprep.subr.mxu1 %v3219_v8 }
 0x619   :  { %1362 = vmatpush1.msra.mxu0 %v3253_v45  ;;  %2052 = vmatpush3.msra.mxu1 %v3254_v46 }
 0x61a   :  { %1363 = vmatprep.subr.mxu0 %v3255_v47  ;;  %2053 = vmatprep.subr.mxu1 %v3219_v8 }
 0x61b   :  { %1364 = vmatpush1.msra.mxu0 %v3256_v49  ;;  %1397 = vmatprep.mubr.f32.mxu0 %v3219_v8 }
 0x61c   :  { %2054 = vmatpush3.msra.mxu1 %v3257_v53  ;;  %2055 = vmatprep.mubr.msk.f32.mxu1 %vm2278_vm1, %v3219_v8 }
 0x61d   :  { %2058 = vmatprep.subr.mxu0 %v3219_v8 }
 0x6bc   :  { %v1222_v51 = vpop.f32.mrf.mxu0  ;;  %v1293_v48 = vpop.f32.mrf.mxu1 }
 0x6bd   :  { %v1298_v7 = vrot.slane %v1222_v51, 2  ;;  %v1317_v52 = vadd.f32 %v3085_v55, %v1293_v48 }
 0x6be   :  { %v1224_v54 = vpop.f32.mrf.mxu0  ;;  %v2022_v2 = vpop.f32.mrf.mxu1 }
 0x6bf   :  { %v1300_v50 = vadd.f32 %v1298_v7, %v2507_v63  ;;  %v1308_v60 = vrot.slane %v1224_v54, 2  ;;  %v1319_v0 = vrot.slane %v1317_v52, 2 }
 0x6c1   :  { %v1663_v4 = vmul.f32 -1.442695, %v1300_v50  ;;  %v1310_v1 = vadd.f32 %v1308_v60, %v2510_v6 }
 0x6c3   :  { %2159 = vpow2.f32 %v1663_v4  ;;  %v1664_v3 = vmul.f32 -1.442695, %v1310_v1 }
 0x6c5   :  { %2161 = vpow2.f32 %v1664_v3 }
 0x6d0   :  { %v2160_v5 = vpop.eup %2159 }
 0x6d1   :  { %v1304_v56 = vadd.f32 1.0, %v2160_v5 }
 0x6d2   :  { %v2162_v59 = vpop.eup %2161 }
 0x6d3   :  { %2163 = vrcp.f32 %v1304_v56  ;;  %v1314_v58 = vadd.f32 1.0, %v2162_v59 }
 0x6d5   :  { %2165 = vrcp.f32 %v1314_v58 }
 0x6e0   :  { %v2164_v57 = vpop.eup %2163 }
 0x6e1   :  { %v1321_v9 = vmul.f32 %v2164_v57, %v1319_v0 }
 0x6e2   :  { %v2166_v11 = vpop.eup %2165 }
 0x6e3   :  { %v1322_v10 = vadd.f32 %v1321_v9, %v2518_v61  ;;  %v1324_v12 = vsub.f32 1.0, %v2166_v11  ;;  %v1328_v17 = vmul.f32 %v2166_v11, %v1326_v13 }
 0x6e5   :  { %2167 = vtanh.f32 %v1322_v10 }
 0x6f2   :  { %v2168_v14 = vpop.eup %2167 }
 0x6f3   :  { %v1325_v15 = vmul.f32 %v2168_v14, %v1324_v12 }
 0x6f5   :  { %v3090_v18 = vadd.f32 %v1328_v17, %v1325_v15 }
 0x6f7   :  { %v1331_v19 = vrot.slane %v3090_v18, 6  ;;  %v3095_v20 = vsel %vm1517_vm7, %v3012_v30, %v3090_v18  ;;  %v1503_v54 = vrot.slane %v3090_v18, 7  ;;  %v1538_v18 = vld [vmem:[%s3183_s3 + $0x2] ss:$0 sm:$0xff] }
 0x6f9   :  { %1398 = vmatmul.mubr.f32.vlgmr.msra.gmra.mxu0 %v1331_v19  ;;  %2056 = vmatmul.mubr.f32.vlgmr.msra.gmra.mxu1 %v1331_v19 }
 0x6fa   :  { %2090 = vmatprep.mubr.msk.f32.mxu0 %vm2278_vm1, %v3219_v8  ;;  %2059 = vmatpush3.msra.mxu0 %v1560_v21 }
 0x6fb   :  { %2060 = vmatprep.subr.mxu0 %v3219_v8 }
 0x6fc   :  { %2061 = vmatpush3.msra.mxu0 %v1559_v22 }
 0x6fd   :  { %2062 = vmatprep.subr.mxu0 %v3219_v8 }
 0x6fe   :  { %2063 = vmatpush3.msra.mxu0 %v1558_v23  ;;  %v1561_v23 = vld [vmem:[%s3183_s3 + $0x4] ss:$0 sm:$0xff] }
 0x6ff   :  { %2064 = vmatprep.subr.mxu0 %v3219_v8 }
 0x700   :  { %2065 = vmatpush3.msra.mxu0 %v1557_v24 }
 0x701   :  { %2066 = vmatprep.subr.mxu0 %v3219_v8 }
 0x702   :  { %2067 = vmatpush3.msra.mxu0 %v1556_v25 }
 0x703   :  { %2068 = vmatprep.subr.mxu0 %v3219_v8 }
 0x704   :  { %2069 = vmatpush3.msra.mxu0 %v1555_v26 }
 0x705   :  { %2070 = vmatprep.subr.mxu0 %v3219_v8 }
 0x706   :  { %2071 = vmatpush3.msra.mxu0 %v1554_v27 }
 0x707   :  { %2072 = vmatprep.subr.mxu0 %v3219_v8 }
 0x708   :  { %2073 = vmatpush3.msra.mxu0 %v1553_v28 }
 0x709   :  { %2074 = vmatprep.subr.mxu0 %v3219_v8 }
 0x70a   :  { %2075 = vmatpush3.msra.mxu0 %v1552_v29 }
 0x70b   :  { %2076 = vmatprep.subr.mxu0 %v3219_v8 }
 0x70c   :  { %2077 = vmatpush3.msra.mxu0 %v1551_v32 }
 0x70d   :  { %2078 = vmatprep.subr.mxu0 %v3219_v8 }
 0x70e   :  { %2079 = vmatpush3.msra.mxu0 %v1550_v35 }
 0x70f   :  { %2080 = vmatprep.subr.mxu0 %v3219_v8 }
 0x710   :  { %2081 = vmatpush3.msra.mxu0 %v1549_v43 }
 0x711   :  { %2082 = vmatprep.subr.mxu0 %v3219_v8 }
 0x712   :  { %2083 = vmatpush3.msra.mxu0 %v1548_v16 }
 0x713   :  { %2084 = vmatprep.subr.mxu0 %v3219_v8 }
 0x714   :  { %2085 = vmatpush3.msra.mxu0 %v1547_v34 }
 0x715   :  { %2086 = vmatprep.subr.mxu0 %v3219_v8 }
 0x716   :  { %2087 = vmatpush3.msra.mxu0 %v1546_v36 }
 0x717   :  { %2088 = vmatprep.subr.mxu0 %v3219_v8 }
 0x718   :  { %2089 = vmatpush3.msra.mxu0 %v1545_v37 }
 0x7b9   :  { %v1399_v38 = vpop.f32.mrf.mxu0  ;;  %v1470_v39 = vpop.f32.mrf.mxu1 }
 0x7ba   :  { %v1475_v40 = vrot.slane %v1399_v38, 1  ;;  %v1494_v8 = vadd.f32 %v3085_v55, %v1470_v39 }
 0x7bb   :  { %v1401_v33 = vpop.f32.mrf.mxu0  ;;  %v2057_v41 = vpop.f32.mrf.mxu1 }
 0x7bc   :  { %v1477_v31 = vadd.f32 %v1475_v40, %v2507_v63  ;;  %v1485_v30 = vrot.slane %v1401_v33, 1  ;;  %v1496_v53 = vrot.slane %v1494_v8, 1 }
 0x7be   :  { %v1665_v62 = vmul.f32 -1.442695, %v1477_v31  ;;  %v1487_v42 = vadd.f32 %v1485_v30, %v2510_v6 }
 0x7c0   :  { %2169 = vpow2.f32 %v1665_v62  ;;  %v1666_v44 = vmul.f32 -1.442695, %v1487_v42 }
 0x7c2   :  { %2171 = vpow2.f32 %v1666_v44 }
 0x7cd   :  { %v2170_v45 = vpop.eup %2169 }
 0x7ce   :  { %v1481_v46 = vadd.f32 1.0, %v2170_v45 }
 0x7cf   :  { %v2172_v47 = vpop.eup %2171 }
 0x7d0   :  { %2173 = vrcp.f32 %v1481_v46  ;;  %v1491_v49 = vadd.f32 1.0, %v2172_v47 }
 0x7d2   :  { %2175 = vrcp.f32 %v1491_v49 }
 0x7dd   :  { %v2174_v51 = vpop.eup %2173 }
 0x7de   :  { %v1498_v48 = vmul.f32 %v2174_v51, %v1496_v53 }
 0x7df   :  { %v2176_v7 = vpop.eup %2175 }
 0x7e0   :  { %v1499_v63 = vadd.f32 %v1498_v48, %v2518_v61  ;;  %v1501_v6 = vsub.f32 1.0, %v2176_v7  ;;  %v1505_v50 = vmul.f32 %v2176_v7, %v1503_v54 }
 0x7e2   :  { %2177 = vtanh.f32 %v1499_v63 }
 0x7ef   :  { %v2178_v2 = vpop.eup %2177 }
 0x7f0   :  { %v1502_v4 = vmul.f32 %v2178_v2, %v1501_v6 }
 0x7f2   :  { %v1506_v60 = vadd.f32 %v1505_v50, %v1502_v4 }
 0x7f4   :  { %v1520_v1 = vsel %vm1519_vm8, %v3095_v20, %v1506_v60  ;;  %v1539_v20 = vld [vmem:[%s3183_s3 + $0x3] ss:$0 sm:$0xff] }
 0x7f5   :  { %v1521_v3 = vrot.slane %v1520_v1, 4 }
 0x7f7   :  { %v1522_v5 = vadd.f32 %v1521_v3, %v1520_v1 }
 0x7f9   :  { %v1523_v56 = vrot.slane %v1522_v5, 2 }
 0x7fb   :  { %v1524_v59 = vadd.f32 %v1523_v56, %v1522_v5 }
 0x7fd   :  { %v1525_v55 = vrot.slane %v1524_v59, 1 }
 0x7ff   :  { %v1526_v52 = vadd.f32 %v1525_v55, %v1524_v59 }
 0x801   :  { %v1528_v58 = vmul.f32 0.125, %v1526_v52 }
 0x803   :  { %v1529_v61 = vsub.f32 %v1520_v1, %v1528_v58 }
 0x805   :  { %v1530_v0 = vmul.f32 %v1529_v61, %v1529_v61 }
 0x807   :  { %v1531_v57 = vrot.slane %v1530_v0, 4 }
 0x809   :  { %v1532_v9 = vadd.f32 %v1531_v57, %v1530_v0 }
 0x80b   :  { %v1533_v10 = vrot.slane %v1532_v9, 2 }
 0x80d   :  { %v1534_v11 = vadd.f32 %v1533_v10, %v1532_v9 }
 0x80f   :  { %v1535_v12 = vrot.slane %v1534_v11, 1 }
 0x811   :  { %v1536_v13 = vadd.f32 %v1535_v12, %v1534_v11 }
 0x813   :  { %v1537_v14 = vmul.f32 0.125, %v1536_v13 }
 0x815   :  { %v1540_v15 = vadd.f32 1e-05, %v1537_v14 }
 0x817   :  { %2179 = vrsqrt.f32 %v1540_v15 }
 0x824   :  { %v2180_v17 = vpop.eup %2179 }
 0x825   :  { %v1542_v19 = vmul.f32 %v2180_v17, %v1529_v61 }
 0x827   :  { %v1543_v21 = vmul.f32 %v1542_v19, %v1538_v18 }
 0x829   :  { %v1544_v22 = vadd.f32 %v1543_v21, %v1539_v20 }
 0x82b   :  { %2091 = vmatmul.mubr.f32.vlgmr.msra.gmra.mxu0 %v1544_v22 }
 0x8eb   :  { %v1628_v24 = vpop.f32.mrf.mxu0 }
 0x8ec   :  { %v1629_v25 = vadd.f32 %v1628_v24, %v1561_v23 }
 0x8ed   :  { %v2092_v26 = vpop.f32.mrf.mxu0 }
 0x8ee   :  { %1633 = vst.msk [vmem:[#allocation5] sm:$0xff] %vm1632_vm9, %v1629_v25 }
 0x8ef   :  { %2261 = shalt.err (!%p2258_p9)
}
 0x8f0   :  { %1643 = dma.vmem_to_hbm [thread:$0]  %s1641_s27, 128, %s3185_s5, [#allocation4]  }
 0x8f1   :  { %2272 = dma.done.wait [#allocation4], 128  }
 0x8f2   :  { %2273 = vsyncadd [#allocation4], 4294967168 }
 0x8f3   :  { %1647 = vsyncpa [#allocation3], 1 }
 0x8f4   :  { %1648 = vsyncpa [#allocation4], 1 }

</bundles_post_ra>
